<compile_context>
chip_gen: v7x
topology: tpu7x:2x2x1
jax: 0.10.0
libtpu: 0.0.40
codegen_flags: <defaults>
</compile_context>

<pallas_src>
import numpy as np
import jax
import jax.numpy as jnp
from jax import lax
from jax.experimental import pallas as pl
from jax.experimental.pallas import tpu as pltpu

EMBED = 32                 # embed_size (scaled down from 1024)
HEADS = 4                  # heads (scaled down from 16)
HEAD_DIM = EMBED // HEADS
EXPANSION = 4              # expansion_factor
HIDDEN = EXPANSION * EMBED
EPS = 1e-5                 # nn.LayerNorm default


def _layernorm(x, g, b):
    mu = jnp.mean(x, axis=-1, keepdims=True)
    var = jnp.mean((x - mu) ** 2, axis=-1, keepdims=True)
    return (x - mu) * lax.rsqrt(var + EPS) * g + b


# ---------------------------------------------------------------------------
# Host-side selector / mask constants (exact 0/1 matrices; built once, DMA'd
# once per kernel call instead of re-built every grid step in-kernel).
# ---------------------------------------------------------------------------
def _selector_constants(S):
    E, H, hd = EMBED, HEADS, HEAD_DIM
    rph = S // H                                  # output rows per query head
    ri = np.arange(E)[:, None]
    ci = np.arange(H * E)[None, :]
    # q_tiled[:, c] = q[:, (c//E)*hd + c%hd]   (query head a = c//E, dim d = c%hd)
    rq = ((ri // hd == ci // E) & (ri % hd == ci % hd)).astype(np.float32)   # (E, H*E)
    # k_tiled[:, c] = k[:, c % E]              (H-fold lane replication via MXU)
    rk = (ri == ci % E).astype(np.float32)                                   # (E, H*E)
    # energy col g = sum of the hd-wide group g of (q_tiled * k_tiled); transposed
    gc = np.arange(H * H)[:, None]
    gr = np.arange(H * E)[None, :]
    gsumT = (gr // hd == gc).astype(np.float32)                              # (H*H, H*E)
    # (v @ vtile)[s, c] = sum_b v[s, b*hd + c%hd]    (head-summed, lane-tiled V)
    vr = np.arange(E)[:, None]
    vc = np.arange(E)[None, :]
    vtile = (vr % hd == vc % hd).astype(np.float32)                          # (E, E)
    # sel[r, c] = 1 iff c//H == r//rph   (key-head group of the query head of row r)
    sr = np.arange(S)[:, None]
    sc = np.arange(H * H)[None, :]
    sel = (sc // H == sr // rph).astype(np.float32)                          # (S, H*H)
    # maskl[r, s] = 1 iff s//H == r % rph
    lr = np.arange(S)[:, None]
    ls = np.arange(S)[None, :]
    maskl = ((ls // H) == (lr % rph)).astype(np.float32)                     # (S, S)
    # maskr[s, c] = 1 iff c//hd == s % H
    ms = np.arange(S)[:, None]
    mc = np.arange(E)[None, :]
    maskr = ((ms % H) == (mc // hd)).astype(np.float32)                      # (S, E)
    return tuple(jnp.asarray(a) for a in (rq, rk, gsumT, vtile, sel, maskl, maskr))


# ---------------------------------------------------------------------------
# Fused kernel: QKV proj + quirky attention + fc_out + LN1 + FFN + LN2.
# Processes an (nb, S, E) batch block per grid step.
# ---------------------------------------------------------------------------
def _block_kernel(x_ref, rq_ref, rk_ref, gsumT_ref, vtile_ref, sel_ref,
                  maskl_ref, maskr_ref,
                  wqkv_ref, wo_ref, bo_ref, g1_ref, b1_ref,
                  w1_ref, bf1_ref, w2_ref, bf2_ref, g2_ref, b2_ref,
                  o_ref, attn_scr):
    f32 = jnp.float32
    nb, S, E = x_ref.shape
    H, hd = HEADS, HEAD_DIM
    R = nb * S
    inv_scale = 1.0 / float(hd) ** 0.5

    x2 = x_ref[...].reshape(R, E)          # leading-dim merge: layout-trivial

    # ---- fused Q/K/V projection: one (R,E) x (E,3E) MXU pass for the block ----
    qkv = jnp.dot(x2, wqkv_ref[...], preferred_element_type=f32)
    q2 = qkv[:, 0 * E:1 * E]
    k2 = qkv[:, 1 * E:2 * E]
    v2 = qkv[:, 2 * E:3 * E]

    # ---- hoisted selector / mask constants (loaded once per step) ----
    rq = rq_ref[...]
    rk = rk_ref[...]
    gsumT = gsumT_ref[...]
    vtile = vtile_ref[...]
    sel = sel_ref[...]
    maskl = maskl_ref[...]
    maskr = maskr_ref[...]

    # ---- all H*H head-pair energies for ALL rows at once ----
    q_t = jnp.dot(q2, rq, preferred_element_type=f32)                 # (R, H*E)
    k_t = jnp.dot(k2, rk, preferred_element_type=f32)                 # (R, H*E)
    energy = lax.dot_general(q_t * k_t, gsumT,
                             (((1,), (1,)), ((), ())),
                             preferred_element_type=f32) * inv_scale  # (R, H*H)
    vt = jnp.dot(v2, vtile, preferred_element_type=f32)               # (R, E)

    # ---- per-batch softmax over the sequence axis + algebraic raw reshape ----
    # Static loop; each (S,E) result lands in VMEM scratch at a static offset so
    # live ranges stay bounded even for large nb.
    for b in range(nb):
        lo = b * S
        eb = energy[lo:lo + S, :]                                      # (S, H*H)
        mmax = jnp.max(eb, axis=0, keepdims=True)
        pexp = jnp.exp(eb - mmax)
        probs = pexp / jnp.sum(pexp, axis=0, keepdims=True)            # (S, H*H)
        # expand_a[r, s] = sum_b probs[s, (r // rph) * H + b]
        expand_a = lax.dot_general(sel, probs, (((1,), (1,)), ((), ())),
                                   preferred_element_type=f32)         # (S, S)
        lmat = expand_a * maskl
        rmat = vt[lo:lo + S, :] * maskr                                 # (S, E)
        # lmat @ rmat == raw reshape of the (H, S, hd) attention output to (S, E)
        attn_scr[lo:lo + S, :] = jnp.dot(lmat, rmat,
                                         preferred_element_type=f32)

    attn2 = attn_scr[...]                                               # (R, E)

    # ---- fc_out + residual + LN1 + FFN + residual + LN2 (all rows at once) ----
    attn_out = jnp.dot(attn2, wo_ref[...], preferred_element_type=f32) + bo_ref[...]
    h1 = attn_out + x2
    ln1 = _layernorm(h1, g1_ref[...], b1_ref[...])          # dropout1 == identity
    hid = jnp.maximum(
        jnp.dot(ln1, w1_ref[...], preferred_element_type=f32) + bf1_ref[...], 0.0)
    ff = jnp.dot(hid, w2_ref[...], preferred_element_type=f32) + bf2_ref[...]
    h2 = ff + ln1
    out = _layernorm(h2, g2_ref[...], b2_ref[...])          # dropout2 == identity

    # ---- lane-dense store: pack each batch's (S, E) rows into one (S*E,)-wide
    # row so the output block is a multiple of 128 lanes (no 32-lane vst.msk). ----
    wide = [
        jnp.concatenate([out[r:r + 1, :] for r in range(b * S, (b + 1) * S)], axis=1)
        for b in range(nb)
    ]
    o_ref[...] = wide[0] if nb == 1 else jnp.concatenate(wide, axis=0)


# ---------------------------------------------------------------------------
# Wrapper
# ---------------------------------------------------------------------------
def _pick_batch_block(n, s):
    """Rows per grid step: aim for >=256 rows (fills a v6e/v7x MXU pass, amortizes
    the ~0.35us/step overhead); the shipped sizes collapse to ONE grid step.
    Cap the block so in/out double-buffers stay tiny vs. v7x's 64 MiB VMEM."""
    target = max(1, -(-256 // s))                       # ceil(256 / s) batch rows
    cap = max(1, (8 << 20) // (4 * s * EMBED * 4))      # ~8 MiB across in/out buffers
    nb = max(1, min(n, target, cap))
    while n % nb:
        nb -= 1
    return nb


def block_forward(x, p, batch_block=None):
    N, S, E = x.shape
    assert E == EMBED
    assert S % HEADS == 0, "in-kernel reshape trick assumes seq divisible by heads"
    nb = batch_block if batch_block is not None else _pick_batch_block(N, S)
    assert N % nb == 0
    f32 = jnp.float32

    rq, rk, gsumT, vtile, sel, maskl, maskr = _selector_constants(S)

    # Pre-transpose weights to (in, out); fuse Q/K/V into one (E, 3E) matrix.
    wqkv_t = jnp.concatenate([p["wq"].T, p["wk"].T, p["wv"].T], axis=1)
    wo_t = p["wo"].T                    # (E, E)
    w1_t = p["w1"].T                    # (E, HIDDEN)
    w2_t = p["w2"].T                    # (HIDDEN, E)

    def full2d(shape):
        # Grid-invariant block: constant index_map means Pallas skips re-DMA
        # across grid steps (no Buffered(1) needed).
        return pl.BlockSpec(shape, lambda n: (0, 0))

    out_wide = pl.pallas_call(
        _block_kernel,
        out_shape=jax.ShapeDtypeStruct((N, S * E), f32),     # lane-dense output
        grid_spec=pltpu.PrefetchScalarGridSpec(
            num_scalar_prefetch=0,
            grid=(N // nb,),
            in_specs=[
                pl.BlockSpec((nb, S, E), lambda n: (n, 0, 0)),     # x
                full2d((E, HEADS * E)),                            # rq
                full2d((E, HEADS * E)),                            # rk
                full2d((HEADS * HEADS, HEADS * E)),                # gsumT
                full2d((E, E)),                                    # vtile
                full2d((S, HEADS * HEADS)),                        # sel
                full2d((S, S)),                                    # maskl
                full2d((S, E)),                                    # maskr
                full2d((E, 3 * E)),                                # fused Wqkv^T
                full2d((E, E)),                                    # Wo^T
                full2d((1, E)),                                    # bo
                full2d((1, E)),                                    # ln1 gamma
                full2d((1, E)),                                    # ln1 beta
                full2d((E, HIDDEN)),                               # W1^T
                full2d((1, HIDDEN)),                               # b1
                full2d((HIDDEN, E)),                               # W2^T
                full2d((1, E)),                                    # b2
                full2d((1, E)),                                    # ln2 gamma
                full2d((1, E)),                                    # ln2 beta
            ],
            out_specs=pl.BlockSpec((nb, S * E), lambda n: (n, 0)),
            scratch_shapes=[pltpu.VMEM((nb * S, E), f32)],
        ),
        compiler_params=pltpu.CompilerParams(
            dimension_semantics=("parallel",)),
    )(x, rq, rk, gsumT, vtile, sel, maskl, maskr,
      wqkv_t, wo_t, p["bo"], p["g1"], p["b1"],
      w1_t, p["bf1"], w2_t, p["bf2"], p["g2"], p["b2"])

    return out_wide.reshape(N, S, E)      # free XLA metadata reshape


# ---------------------------------------------------------------------------
# Pure-JAX reference that mirrors the PyTorch forward line-by-line.
# ---------------------------------------------------------------------------
def _ln_ref(x, g, b):
    mu = jnp.mean(x, axis=-1, keepdims=True)
    var = jnp.mean((x - mu) ** 2, axis=-1, keepdims=True)
    return (x - mu) / jnp.sqrt(var + EPS) * g + b


def reference_forward(x, p):
    N, S, E = x.shape
    q = x @ p["wq"].T
    k = x @ p["wk"].T
    v = x @ p["wv"].T
    qp = q.reshape(N, S, HEADS, HEAD_DIM).transpose(0, 2, 1, 3)
    kp = k.reshape(N, S, HEADS, HEAD_DIM).transpose(0, 2, 1, 3)
    vp = v.reshape(N, S, HEADS, HEAD_DIM).transpose(0, 2, 1, 3)
    energy = jnp.einsum('nqhd,nkhd->nqkh', qp, kp)
    attn = jax.nn.softmax(energy / HEAD_DIM ** 0.5, axis=3)
    out = jnp.einsum('nqkh,nvhd->nqhd', attn, vp).reshape(N, S, E)
    attn_out = out @ p["wo"].T + p["bo"]
    h1 = attn_out + x
    ln1 = _ln_ref(h1, p["g1"], p["b1"])
    ff = jnp.maximum(ln1 @ p["w1"].T + p["bf1"], 0.0) @ p["w2"].T + p["bf2"]
    h2 = ff + ln1
    return _ln_ref(h2, p["g2"], p["b2"])


def init_params(key):
    ks = jax.random.split(key, 8)
    s = 0.05
    f32 = jnp.float32
    return {
        "wq": s * jax.random.normal(ks[0], (EMBED, EMBED), f32),
        "wk": s * jax.random.normal(ks[1], (EMBED, EMBED), f32),
        "wv": s * jax.random.normal(ks[2], (EMBED, EMBED), f32),
        "wo": s * jax.random.normal(ks[3], (EMBED, EMBED), f32),
        "bo": s * jax.random.normal(ks[4], (1, EMBED), f32),
        "g1": jnp.ones((1, EMBED), f32),
        "b1": jnp.zeros((1, EMBED), f32),
        "w1": s * jax.random.normal(ks[5], (HIDDEN, EMBED), f32),
        "bf1": s * jax.random.normal(ks[6], (1, HIDDEN), f32),
        "w2": s * jax.random.normal(ks[7], (EMBED, HIDDEN), f32),
        "bf2": jnp.zeros((1, EMBED), f32),
        "g2": jnp.ones((1, EMBED), f32),
        "b2": jnp.zeros((1, EMBED), f32),
    }


if __name__ == "__main__":
    key = jax.random.PRNGKey(0)
    k_x, k_p = jax.random.split(key)
    N, S = 2, 8
    x = jax.random.normal(k_x, (N, S, EMBED), jnp.float32)
    params = init_params(k_p)

    out = block_forward(x, params)          # single grid step (nb = N = 2)
    out = jax.block_until_ready(out)

    ref = reference_forward(x, params)
    assert out.shape == (N, S, EMBED)
    max_err = float(jnp.max(jnp.abs(out - ref)))
    if max_err > 1e-3:
        raise AssertionError(f"kernel mismatch vs reference: max_err={max_err}")
    print("KERNEL_OK")
</pallas_src>

<mosaic_0001>
module attributes {stable_mosaic.version = 11 : i64} {
  func.func @_block_kernel(%arg0: i32, %arg1: memref<2x8x32xf32, #tpu.memory_space<vmem>>, %arg2: memref<32x128xf32, #tpu.memory_space<vmem>>, %arg3: memref<32x128xf32, #tpu.memory_space<vmem>>, %arg4: memref<16x128xf32, #tpu.memory_space<vmem>>, %arg5: memref<32x32xf32, #tpu.memory_space<vmem>>, %arg6: memref<8x16xf32, #tpu.memory_space<vmem>>, %arg7: memref<8x8xf32, #tpu.memory_space<vmem>>, %arg8: memref<8x32xf32, #tpu.memory_space<vmem>>, %arg9: memref<32x96xf32, #tpu.memory_space<vmem>>, %arg10: memref<32x32xf32, #tpu.memory_space<vmem>>, %arg11: memref<1x32xf32, #tpu.memory_space<vmem>>, %arg12: memref<1x32xf32, #tpu.memory_space<vmem>>, %arg13: memref<1x32xf32, #tpu.memory_space<vmem>>, %arg14: memref<32x128xf32, #tpu.memory_space<vmem>>, %arg15: memref<1x128xf32, #tpu.memory_space<vmem>>, %arg16: memref<128x32xf32, #tpu.memory_space<vmem>>, %arg17: memref<1x32xf32, #tpu.memory_space<vmem>>, %arg18: memref<1x32xf32, #tpu.memory_space<vmem>>, %arg19: memref<1x32xf32, #tpu.memory_space<vmem>>, %arg20: memref<2x256xf32, #tpu.memory_space<vmem>>, %arg21: memref<16x32xf32, #tpu.memory_space<vmem>>) attributes {dimension_semantics = [#tpu.dimension_semantics<parallel>], iteration_bounds = array<i64: 1>, scalar_prefetch = 0 : i64, scratch_operands = 1 : i64, tpu.core_type = #tpu.core_type<tc>, window_params = [{transform_indices = @transform_0, window_bounds = array<i64: 2, 8, 32>}, {pipeline_mode = #tpu.pipeline_mode<synchronous>, transform_indices = @transform_1, window_bounds = array<i64: 32, 128>}, {pipeline_mode = #tpu.pipeline_mode<synchronous>, transform_indices = @transform_2, window_bounds = array<i64: 32, 128>}, {pipeline_mode = #tpu.pipeline_mode<synchronous>, transform_indices = @transform_3, window_bounds = array<i64: 16, 128>}, {pipeline_mode = #tpu.pipeline_mode<synchronous>, transform_indices = @transform_4, window_bounds = array<i64: 32, 32>}, {pipeline_mode = #tpu.pipeline_mode<synchronous>, transform_indices = @transform_5, window_bounds = array<i64: 8, 16>}, {pipeline_mode = #tpu.pipeline_mode<synchronous>, transform_indices = @transform_6, window_bounds = array<i64: 8, 8>}, {pipeline_mode = #tpu.pipeline_mode<synchronous>, transform_indices = @transform_7, window_bounds = array<i64: 8, 32>}, {pipeline_mode = #tpu.pipeline_mode<synchronous>, transform_indices = @transform_8, window_bounds = array<i64: 32, 96>}, {pipeline_mode = #tpu.pipeline_mode<synchronous>, transform_indices = @transform_9, window_bounds = array<i64: 32, 32>}, {pipeline_mode = #tpu.pipeline_mode<synchronous>, transform_indices = @transform_10, window_bounds = array<i64: 1, 32>}, {pipeline_mode = #tpu.pipeline_mode<synchronous>, transform_indices = @transform_11, window_bounds = array<i64: 1, 32>}, {pipeline_mode = #tpu.pipeline_mode<synchronous>, transform_indices = @transform_12, window_bounds = array<i64: 1, 32>}, {pipeline_mode = #tpu.pipeline_mode<synchronous>, transform_indices = @transform_13, window_bounds = array<i64: 32, 128>}, {pipeline_mode = #tpu.pipeline_mode<synchronous>, transform_indices = @transform_14, window_bounds = array<i64: 1, 128>}, {pipeline_mode = #tpu.pipeline_mode<synchronous>, transform_indices = @transform_15, window_bounds = array<i64: 128, 32>}, {pipeline_mode = #tpu.pipeline_mode<synchronous>, transform_indices = @transform_16, window_bounds = array<i64: 1, 32>}, {pipeline_mode = #tpu.pipeline_mode<synchronous>, transform_indices = @transform_17, window_bounds = array<i64: 1, 32>}, {pipeline_mode = #tpu.pipeline_mode<synchronous>, transform_indices = @transform_18, window_bounds = array<i64: 1, 32>}, {transform_indices = @transform_19, window_bounds = array<i64: 2, 256>}]} {
    %c0 = arith.constant 0 : index
    %c0_0 = arith.constant 0 : index
    %c0_1 = arith.constant 0 : index
    %0 = vector.load %arg1[%c0, %c0_0, %c0_1] : memref<2x8x32xf32, #tpu.memory_space<vmem>>, vector<2x8x32xf32>
    %1 = vector.shape_cast %0 : vector<2x8x32xf32> to vector<16x32xf32>
    %c0_2 = arith.constant 0 : index
    %c0_3 = arith.constant 0 : index
    %2 = vector.load %arg9[%c0_2, %c0_3] : memref<32x96xf32, #tpu.memory_space<vmem>>, vector<32x96xf32>
    %cst = arith.constant dense<0.000000e+00> : vector<16x96xf32>
    %3 = tpu.matmul %1, %2, %cst {dimension_numbers = #tpu.dot_dimension_numbers<[1], [0], [0], [1], [0, 0, 1, 1], [], []>} : vector<16x32xf32>, vector<32x96xf32>, vector<16x96xf32> -> vector<16x96xf32>
    %4 = vector.extract_strided_slice %3 {offsets = [0, 0], sizes = [16, 32], strides = [1, 1]} : vector<16x96xf32> to vector<16x32xf32>
    %5 = vector.extract_strided_slice %3 {offsets = [0, 32], sizes = [16, 32], strides = [1, 1]} : vector<16x96xf32> to vector<16x32xf32>
    %6 = vector.extract_strided_slice %3 {offsets = [0, 64], sizes = [16, 32], strides = [1, 1]} : vector<16x96xf32> to vector<16x32xf32>
    %c0_4 = arith.constant 0 : index
    %c0_5 = arith.constant 0 : index
    %7 = vector.load %arg2[%c0_4, %c0_5] : memref<32x128xf32, #tpu.memory_space<vmem>>, vector<32x128xf32>
    %c0_6 = arith.constant 0 : index
    %c0_7 = arith.constant 0 : index
    %8 = vector.load %arg3[%c0_6, %c0_7] : memref<32x128xf32, #tpu.memory_space<vmem>>, vector<32x128xf32>
    %c0_8 = arith.constant 0 : index
    %c0_9 = arith.constant 0 : index
    %9 = vector.load %arg4[%c0_8, %c0_9] : memref<16x128xf32, #tpu.memory_space<vmem>>, vector<16x128xf32>
    %c0_10 = arith.constant 0 : index
    %c0_11 = arith.constant 0 : index
    %10 = vector.load %arg5[%c0_10, %c0_11] : memref<32x32xf32, #tpu.memory_space<vmem>>, vector<32x32xf32>
    %c0_12 = arith.constant 0 : index
    %c0_13 = arith.constant 0 : index
    %11 = vector.load %arg6[%c0_12, %c0_13] : memref<8x16xf32, #tpu.memory_space<vmem>>, vector<8x16xf32>
    %c0_14 = arith.constant 0 : index
    %c0_15 = arith.constant 0 : index
    %12 = vector.load %arg7[%c0_14, %c0_15] : memref<8x8xf32, #tpu.memory_space<vmem>>, vector<8x8xf32>
    %c0_16 = arith.constant 0 : index
    %c0_17 = arith.constant 0 : index
    %13 = vector.load %arg8[%c0_16, %c0_17] : memref<8x32xf32, #tpu.memory_space<vmem>>, vector<8x32xf32>
    %cst_18 = arith.constant dense<0.000000e+00> : vector<16x128xf32>
    %14 = tpu.matmul %4, %7, %cst_18 {dimension_numbers = #tpu.dot_dimension_numbers<[1], [0], [0], [1], [0, 0, 1, 1], [], []>} : vector<16x32xf32>, vector<32x128xf32>, vector<16x128xf32> -> vector<16x128xf32>
    %cst_19 = arith.constant dense<0.000000e+00> : vector<16x128xf32>
    %15 = tpu.matmul %5, %8, %cst_19 {dimension_numbers = #tpu.dot_dimension_numbers<[1], [0], [0], [1], [0, 0, 1, 1], [], []>} : vector<16x32xf32>, vector<32x128xf32>, vector<16x128xf32> -> vector<16x128xf32>
    %16 = arith.mulf %14, %15 : vector<16x128xf32>
    %cst_20 = arith.constant dense<0.000000e+00> : vector<16x16xf32>
    %17 = tpu.matmul %16, %9, %cst_20 {dimension_numbers = #tpu.dot_dimension_numbers<[1], [1], [0], [0], [0, 0, 1, 0], [], []>} : vector<16x128xf32>, vector<16x128xf32>, vector<16x16xf32> -> vector<16x16xf32>
    %cst_21 = arith.constant 0.353553385 : f32
    %18 = vector.broadcast %cst_21 : f32 to vector<16x16xf32>
    %19 = arith.mulf %17, %18 : vector<16x16xf32>
    %cst_22 = arith.constant dense<0.000000e+00> : vector<16x32xf32>
    %20 = tpu.matmul %6, %10, %cst_22 {dimension_numbers = #tpu.dot_dimension_numbers<[1], [0], [0], [1], [0, 0, 1, 1], [], []>} : vector<16x32xf32>, vector<32x32xf32>, vector<16x32xf32> -> vector<16x32xf32>
    %21 = vector.extract_strided_slice %19 {offsets = [0, 0], sizes = [8, 16], strides = [1, 1]} : vector<16x16xf32> to vector<8x16xf32>
    %cst_23 = arith.constant dense<0xFF800000> : vector<16xf32>
    %22 = vector.multi_reduction <maximumf>, %21, %cst_23 [0] : vector<8x16xf32> to vector<16xf32>
    %23 = vector.shape_cast %22 : vector<16xf32> to vector<1x16xf32>
    %24 = vector.broadcast %23 : vector<1x16xf32> to vector<8x16xf32>
    %25 = arith.subf %21, %24 : vector<8x16xf32>
    %26 = math.exp %25 : vector<8x16xf32>
    %cst_24 = arith.constant dense<0.000000e+00> : vector<16xf32>
    %27 = vector.multi_reduction <add>, %26, %cst_24 [0] : vector<8x16xf32> to vector<16xf32>
    %28 = vector.shape_cast %27 : vector<16xf32> to vector<1x16xf32>
    %29 = vector.broadcast %28 : vector<1x16xf32> to vector<8x16xf32>
    %30 = arith.divf %26, %29 : vector<8x16xf32>
    %cst_25 = arith.constant dense<0.000000e+00> : vector<8x8xf32>
    %31 = tpu.matmul %11, %30, %cst_25 {dimension_numbers = #tpu.dot_dimension_numbers<[1], [1], [0], [0], [0, 0, 1, 0], [], []>} : vector<8x16xf32>, vector<8x16xf32>, vector<8x8xf32> -> vector<8x8xf32>
    %32 = arith.mulf %31, %12 : vector<8x8xf32>
    %33 = vector.extract_strided_slice %20 {offsets = [0, 0], sizes = [8, 32], strides = [1, 1]} : vector<16x32xf32> to vector<8x32xf32>
    %34 = arith.mulf %33, %13 : vector<8x32xf32>
    %cst_26 = arith.constant dense<0.000000e+00> : vector<8x32xf32>
    %35 = tpu.matmul %32, %34, %cst_26 {dimension_numbers = #tpu.dot_dimension_numbers<[1], [0], [0], [1], [0, 0, 1, 1], [], []>} : vector<8x8xf32>, vector<8x32xf32>, vector<8x32xf32> -> vector<8x32xf32>
    %c0_27 = arith.constant 0 : index
    %c0_28 = arith.constant 0 : index
    %36 = vector.load %arg21[%c0_27, %c0_28] : memref<16x32xf32, #tpu.memory_space<vmem>>, vector<8x32xf32>
    tpu.vector_store %arg21[%c0_27, %c0_28], %35 {strides = array<i32>} : memref<16x32xf32, #tpu.memory_space<vmem>>, vector<8x32xf32>,
    %37 = vector.extract_strided_slice %19 {offsets = [8, 0], sizes = [8, 16], strides = [1, 1]} : vector<16x16xf32> to vector<8x16xf32>
    %cst_29 = arith.constant dense<0xFF800000> : vector<16xf32>
    %38 = vector.multi_reduction <maximumf>, %37, %cst_29 [0] : vector<8x16xf32> to vector<16xf32>
    %39 = vector.shape_cast %38 : vector<16xf32> to vector<1x16xf32>
    %40 = vector.broadcast %39 : vector<1x16xf32> to vector<8x16xf32>
    %41 = arith.subf %37, %40 : vector<8x16xf32>
    %42 = math.exp %41 : vector<8x16xf32>
    %cst_30 = arith.constant dense<0.000000e+00> : vector<16xf32>
    %43 = vector.multi_reduction <add>, %42, %cst_30 [0] : vector<8x16xf32> to vector<16xf32>
    %44 = vector.shape_cast %43 : vector<16xf32> to vector<1x16xf32>
    %45 = vector.broadcast %44 : vector<1x16xf32> to vector<8x16xf32>
    %46 = arith.divf %42, %45 : vector<8x16xf32>
    %cst_31 = arith.constant dense<0.000000e+00> : vector<8x8xf32>
    %47 = tpu.matmul %11, %46, %cst_31 {dimension_numbers = #tpu.dot_dimension_numbers<[1], [1], [0], [0], [0, 0, 1, 0], [], []>} : vector<8x16xf32>, vector<8x16xf32>, vector<8x8xf32> -> vector<8x8xf32>
    %48 = arith.mulf %47, %12 : vector<8x8xf32>
    %49 = vector.extract_strided_slice %20 {offsets = [8, 0], sizes = [8, 32], strides = [1, 1]} : vector<16x32xf32> to vector<8x32xf32>
    %50 = arith.mulf %49, %13 : vector<8x32xf32>
    %cst_32 = arith.constant dense<0.000000e+00> : vector<8x32xf32>
    %51 = tpu.matmul %48, %50, %cst_32 {dimension_numbers = #tpu.dot_dimension_numbers<[1], [0], [0], [1], [0, 0, 1, 1], [], []>} : vector<8x8xf32>, vector<8x32xf32>, vector<8x32xf32> -> vector<8x32xf32>
    %c8 = arith.constant 8 : index
    %c0_33 = arith.constant 0 : index
    %52 = vector.load %arg21[%c8, %c0_33] : memref<16x32xf32, #tpu.memory_space<vmem>>, vector<8x32xf32>
    tpu.vector_store %arg21[%c8, %c0_33], %51 {strides = array<i32>} : memref<16x32xf32, #tpu.memory_space<vmem>>, vector<8x32xf32>,
    %c0_34 = arith.constant 0 : index
    %c0_35 = arith.constant 0 : index
    %53 = vector.load %arg21[%c0_34, %c0_35] : memref<16x32xf32, #tpu.memory_space<vmem>>, vector<16x32xf32>
    %c0_36 = arith.constant 0 : index
    %c0_37 = arith.constant 0 : index
    %54 = vector.load %arg10[%c0_36, %c0_37] : memref<32x32xf32, #tpu.memory_space<vmem>>, vector<32x32xf32>
    %cst_38 = arith.constant dense<0.000000e+00> : vector<16x32xf32>
    %55 = tpu.matmul %53, %54, %cst_38 {dimension_numbers = #tpu.dot_dimension_numbers<[1], [0], [0], [1], [0, 0, 1, 1], [], []>} : vector<16x32xf32>, vector<32x32xf32>, vector<16x32xf32> -> vector<16x32xf32>
    %c0_39 = arith.constant 0 : index
    %c0_40 = arith.constant 0 : index
    %56 = vector.load %arg11[%c0_39, %c0_40] : memref<1x32xf32, #tpu.memory_space<vmem>>, vector<1x32xf32>
    %57 = vector.broadcast %56 : vector<1x32xf32> to vector<16x32xf32>
    %58 = arith.addf %55, %57 : vector<16x32xf32>
    %59 = arith.addf %58, %1 : vector<16x32xf32>
    %c0_41 = arith.constant 0 : index
    %c0_42 = arith.constant 0 : index
    %60 = vector.load %arg12[%c0_41, %c0_42] : memref<1x32xf32, #tpu.memory_space<vmem>>, vector<1x32xf32>
    %c0_43 = arith.constant 0 : index
    %c0_44 = arith.constant 0 : index
    %61 = vector.load %arg13[%c0_43, %c0_44] : memref<1x32xf32, #tpu.memory_space<vmem>>, vector<1x32xf32>
    %cst_45 = arith.constant dense<0.000000e+00> : vector<16xf32>
    %62 = vector.multi_reduction <add>, %59, %cst_45 [1] : vector<16x32xf32> to vector<16xf32>
    %63 = vector.shape_cast %62 : vector<16xf32> to vector<16x1xf32>
    %cst_46 = arith.constant 3.200000e+01 : f32
    %64 = vector.broadcast %cst_46 : f32 to vector<16x1xf32>
    %65 = arith.divf %63, %64 : vector<16x1xf32>
    %66 = vector.broadcast %65 : vector<16x1xf32> to vector<16x32xf32>
    %67 = arith.subf %59, %66 : vector<16x32xf32>
    %68 = arith.mulf %67, %67 : vector<16x32xf32>
    %cst_47 = arith.constant dense<0.000000e+00> : vector<16xf32>
    %69 = vector.multi_reduction <add>, %68, %cst_47 [1] : vector<16x32xf32> to vector<16xf32>
    %70 = vector.shape_cast %69 : vector<16xf32> to vector<16x1xf32>
    %cst_48 = arith.constant 3.200000e+01 : f32
    %71 = vector.broadcast %cst_48 : f32 to vector<16x1xf32>
    %72 = arith.divf %70, %71 : vector<16x1xf32>
    %73 = vector.broadcast %65 : vector<16x1xf32> to vector<16x32xf32>
    %74 = arith.subf %59, %73 : vector<16x32xf32>
    %cst_49 = arith.constant 9.99999974E-6 : f32
    %75 = vector.broadcast %cst_49 : f32 to vector<16x1xf32>
    %76 = arith.addf %72, %75 : vector<16x1xf32>
    %77 = math.rsqrt %76 : vector<16x1xf32>
    %78 = vector.broadcast %77 : vector<16x1xf32> to vector<16x32xf32>
    %79 = arith.mulf %74, %78 : vector<16x32xf32>
    %80 = vector.broadcast %60 : vector<1x32xf32> to vector<16x32xf32>
    %81 = arith.mulf %79, %80 : vector<16x32xf32>
    %82 = vector.broadcast %61 : vector<1x32xf32> to vector<16x32xf32>
    %83 = arith.addf %81, %82 : vector<16x32xf32>
    %c0_50 = arith.constant 0 : index
    %c0_51 = arith.constant 0 : index
    %84 = vector.load %arg14[%c0_50, %c0_51] : memref<32x128xf32, #tpu.memory_space<vmem>>, vector<32x128xf32>
    %cst_52 = arith.constant dense<0.000000e+00> : vector<16x128xf32>
    %85 = tpu.matmul %83, %84, %cst_52 {dimension_numbers = #tpu.dot_dimension_numbers<[1], [0], [0], [1], [0, 0, 1, 1], [], []>} : vector<16x32xf32>, vector<32x128xf32>, vector<16x128xf32> -> vector<16x128xf32>
    %c0_53 = arith.constant 0 : index
    %c0_54 = arith.constant 0 : index
    %86 = vector.load %arg15[%c0_53, %c0_54] : memref<1x128xf32, #tpu.memory_space<vmem>>, vector<1x128xf32>
    %87 = vector.broadcast %86 : vector<1x128xf32> to vector<16x128xf32>
    %88 = arith.addf %85, %87 : vector<16x128xf32>
    %cst_55 = arith.constant 0.000000e+00 : f32
    %89 = vector.broadcast %cst_55 : f32 to vector<16x128xf32>
    %90 = arith.maximumf %88, %89 : vector<16x128xf32>
    %c0_56 = arith.constant 0 : index
    %c0_57 = arith.constant 0 : index
    %91 = vector.load %arg16[%c0_56, %c0_57] : memref<128x32xf32, #tpu.memory_space<vmem>>, vector<128x32xf32>
    %cst_58 = arith.constant dense<0.000000e+00> : vector<16x32xf32>
    %92 = tpu.matmul %90, %91, %cst_58 {dimension_numbers = #tpu.dot_dimension_numbers<[1], [0], [0], [1], [0, 0, 1, 1], [], []>} : vector<16x128xf32>, vector<128x32xf32>, vector<16x32xf32> -> vector<16x32xf32>
    %c0_59 = arith.constant 0 : index
    %c0_60 = arith.constant 0 : index
    %93 = vector.load %arg17[%c0_59, %c0_60] : memref<1x32xf32, #tpu.memory_space<vmem>>, vector<1x32xf32>
    %94 = vector.broadcast %93 : vector<1x32xf32> to vector<16x32xf32>
    %95 = arith.addf %92, %94 : vector<16x32xf32>
    %96 = arith.addf %95, %83 : vector<16x32xf32>
    %c0_61 = arith.constant 0 : index
    %c0_62 = arith.constant 0 : index
    %97 = vector.load %arg18[%c0_61, %c0_62] : memref<1x32xf32, #tpu.memory_space<vmem>>, vector<1x32xf32>
    %c0_63 = arith.constant 0 : index
    %c0_64 = arith.constant 0 : index
    %98 = vector.load %arg19[%c0_63, %c0_64] : memref<1x32xf32, #tpu.memory_space<vmem>>, vector<1x32xf32>
    %cst_65 = arith.constant dense<0.000000e+00> : vector<16xf32>
    %99 = vector.multi_reduction <add>, %96, %cst_65 [1] : vector<16x32xf32> to vector<16xf32>
    %100 = vector.shape_cast %99 : vector<16xf32> to vector<16x1xf32>
    %cst_66 = arith.constant 3.200000e+01 : f32
    %101 = vector.broadcast %cst_66 : f32 to vector<16x1xf32>
    %102 = arith.divf %100, %101 : vector<16x1xf32>
    %103 = vector.broadcast %102 : vector<16x1xf32> to vector<16x32xf32>
    %104 = arith.subf %96, %103 : vector<16x32xf32>
    %105 = arith.mulf %104, %104 : vector<16x32xf32>
    %cst_67 = arith.constant dense<0.000000e+00> : vector<16xf32>
    %106 = vector.multi_reduction <add>, %105, %cst_67 [1] : vector<16x32xf32> to vector<16xf32>
    %107 = vector.shape_cast %106 : vector<16xf32> to vector<16x1xf32>
    %cst_68 = arith.constant 3.200000e+01 : f32
    %108 = vector.broadcast %cst_68 : f32 to vector<16x1xf32>
    %109 = arith.divf %107, %108 : vector<16x1xf32>
    %110 = vector.broadcast %102 : vector<16x1xf32> to vector<16x32xf32>
    %111 = arith.subf %96, %110 : vector<16x32xf32>
    %cst_69 = arith.constant 9.99999974E-6 : f32
    %112 = vector.broadcast %cst_69 : f32 to vector<16x1xf32>
    %113 = arith.addf %109, %112 : vector<16x1xf32>
    %114 = math.rsqrt %113 : vector<16x1xf32>
    %115 = vector.broadcast %114 : vector<16x1xf32> to vector<16x32xf32>
    %116 = arith.mulf %111, %115 : vector<16x32xf32>
    %117 = vector.broadcast %97 : vector<1x32xf32> to vector<16x32xf32>
    %118 = arith.mulf %116, %117 : vector<16x32xf32>
    %119 = vector.broadcast %98 : vector<1x32xf32> to vector<16x32xf32>
    %120 = arith.addf %118, %119 : vector<16x32xf32>
    %121 = vector.extract_strided_slice %120 {offsets = [0, 0], sizes = [1, 32], strides = [1, 1]} : vector<16x32xf32> to vector<1x32xf32>
    %122 = vector.extract_strided_slice %120 {offsets = [1, 0], sizes = [1, 32], strides = [1, 1]} : vector<16x32xf32> to vector<1x32xf32>
    %123 = vector.extract_strided_slice %120 {offsets = [2, 0], sizes = [1, 32], strides = [1, 1]} : vector<16x32xf32> to vector<1x32xf32>
    %124 = vector.extract_strided_slice %120 {offsets = [3, 0], sizes = [1, 32], strides = [1, 1]} : vector<16x32xf32> to vector<1x32xf32>
    %125 = vector.extract_strided_slice %120 {offsets = [4, 0], sizes = [1, 32], strides = [1, 1]} : vector<16x32xf32> to vector<1x32xf32>
    %126 = vector.extract_strided_slice %120 {offsets = [5, 0], sizes = [1, 32], strides = [1, 1]} : vector<16x32xf32> to vector<1x32xf32>
    %127 = vector.extract_strided_slice %120 {offsets = [6, 0], sizes = [1, 32], strides = [1, 1]} : vector<16x32xf32> to vector<1x32xf32>
    %128 = vector.extract_strided_slice %120 {offsets = [7, 0], sizes = [1, 32], strides = [1, 1]} : vector<16x32xf32> to vector<1x32xf32>
    %129 = tpu.concatenate %121, %122, %123, %124, %125, %126, %127, %128 in 1 : vector<1x32xf32>, vector<1x32xf32>, vector<1x32xf32>, vector<1x32xf32>, vector<1x32xf32>, vector<1x32xf32>, vector<1x32xf32>, vector<1x32xf32> -> vector<1x256xf32>
    %130 = vector.extract_strided_slice %120 {offsets = [8, 0], sizes = [1, 32], strides = [1, 1]} : vector<16x32xf32> to vector<1x32xf32>
    %131 = vector.extract_strided_slice %120 {offsets = [9, 0], sizes = [1, 32], strides = [1, 1]} : vector<16x32xf32> to vector<1x32xf32>
    %132 = vector.extract_strided_slice %120 {offsets = [10, 0], sizes = [1, 32], strides = [1, 1]} : vector<16x32xf32> to vector<1x32xf32>
    %133 = vector.extract_strided_slice %120 {offsets = [11, 0], sizes = [1, 32], strides = [1, 1]} : vector<16x32xf32> to vector<1x32xf32>
    %134 = vector.extract_strided_slice %120 {offsets = [12, 0], sizes = [1, 32], strides = [1, 1]} : vector<16x32xf32> to vector<1x32xf32>
    %135 = vector.extract_strided_slice %120 {offsets = [13, 0], sizes = [1, 32], strides = [1, 1]} : vector<16x32xf32> to vector<1x32xf32>
    %136 = vector.extract_strided_slice %120 {offsets = [14, 0], sizes = [1, 32], strides = [1, 1]} : vector<16x32xf32> to vector<1x32xf32>
    %137 = vector.extract_strided_slice %120 {offsets = [15, 0], sizes = [1, 32], strides = [1, 1]} : vector<16x32xf32> to vector<1x32xf32>
    %138 = tpu.concatenate %130, %131, %132, %133, %134, %135, %136, %137 in 1 : vector<1x32xf32>, vector<1x32xf32>, vector<1x32xf32>, vector<1x32xf32>, vector<1x32xf32>, vector<1x32xf32>, vector<1x32xf32>, vector<1x32xf32> -> vector<1x256xf32>
    %139 = tpu.concatenate %129, %138 in 0 : vector<1x256xf32>, vector<1x256xf32> -> vector<2x256xf32>
    %c0_70 = arith.constant 0 : index
    %c0_71 = arith.constant 0 : index
    %140 = vector.load %arg20[%c0_70, %c0_71] : memref<2x256xf32, #tpu.memory_space<vmem>>, vector<2x256xf32>
    tpu.vector_store %arg20[%c0_70, %c0_71], %139 {strides = array<i32>} : memref<2x256xf32, #tpu.memory_space<vmem>>, vector<2x256xf32>,
    return
  }
  func.func @transform_0(%arg0: i32) -> (i32, i32, i32) {
    %c0_i32 = arith.constant 0 : i32
    %c0_i32_0 = arith.constant 0 : i32
    %c0_i32_1 = arith.constant 0 : i32
    return %arg0, %c0_i32, %c0_i32_0 : i32, i32, i32
  }
  func.func @transform_1(%arg0: i32) -> (i32, i32) {
    %c0_i32 = arith.constant 0 : i32
    %c0_i32_0 = arith.constant 0 : i32
    %c0_i32_1 = arith.constant 0 : i32
    return %c0_i32, %c0_i32_0 : i32, i32
  }
  func.func @transform_2(%arg0: i32) -> (i32, i32) {
    %c0_i32 = arith.constant 0 : i32
    %c0_i32_0 = arith.constant 0 : i32
    %c0_i32_1 = arith.constant 0 : i32
    return %c0_i32, %c0_i32_0 : i32, i32
  }
  func.func @transform_3(%arg0: i32) -> (i32, i32) {
    %c0_i32 = arith.constant 0 : i32
    %c0_i32_0 = arith.constant 0 : i32
    %c0_i32_1 = arith.constant 0 : i32
    return %c0_i32, %c0_i32_0 : i32, i32
  }
  func.func @transform_4(%arg0: i32) -> (i32, i32) {
    %c0_i32 = arith.constant 0 : i32
    %c0_i32_0 = arith.constant 0 : i32
    %c0_i32_1 = arith.constant 0 : i32
    return %c0_i32, %c0_i32_0 : i32, i32
  }
  func.func @transform_5(%arg0: i32) -> (i32, i32) {
    %c0_i32 = arith.constant 0 : i32
    %c0_i32_0 = arith.constant 0 : i32
    %c0_i32_1 = arith.constant 0 : i32
    return %c0_i32, %c0_i32_0 : i32, i32
  }
  func.func @transform_6(%arg0: i32) -> (i32, i32) {
    %c0_i32 = arith.constant 0 : i32
    %c0_i32_0 = arith.constant 0 : i32
    %c0_i32_1 = arith.constant 0 : i32
    return %c0_i32, %c0_i32_0 : i32, i32
  }
  func.func @transform_7(%arg0: i32) -> (i32, i32) {
    %c0_i32 = arith.constant 0 : i32
    %c0_i32_0 = arith.constant 0 : i32
    %c0_i32_1 = arith.constant 0 : i32
    return %c0_i32, %c0_i32_0 : i32, i32
  }
  func.func @transform_8(%arg0: i32) -> (i32, i32) {
    %c0_i32 = arith.constant 0 : i32
    %c0_i32_0 = arith.constant 0 : i32
    %c0_i32_1 = arith.constant 0 : i32
    return %c0_i32, %c0_i32_0 : i32, i32
  }
  func.func @transform_9(%arg0: i32) -> (i32, i32) {
    %c0_i32 = arith.constant 0 : i32
    %c0_i32_0 = arith.constant 0 : i32
    %c0_i32_1 = arith.constant 0 : i32
    return %c0_i32, %c0_i32_0 : i32, i32
  }
  func.func @transform_10(%arg0: i32) -> (i32, i32) {
    %c0_i32 = arith.constant 0 : i32
    %c0_i32_0 = arith.constant 0 : i32
    %c0_i32_1 = arith.constant 0 : i32
    return %c0_i32, %c0_i32_0 : i32, i32
  }
  func.func @transform_11(%arg0: i32) -> (i32, i32) {
    %c0_i32 = arith.constant 0 : i32
    %c0_i32_0 = arith.constant 0 : i32
    %c0_i32_1 = arith.constant 0 : i32
    return %c0_i32, %c0_i32_0 : i32, i32
  }
  func.func @transform_12(%arg0: i32) -> (i32, i32) {
    %c0_i32 = arith.constant 0 : i32
    %c0_i32_0 = arith.constant 0 : i32
    %c0_i32_1 = arith.constant 0 : i32
    return %c0_i32, %c0_i32_0 : i32, i32
  }
  func.func @transform_13(%arg0: i32) -> (i32, i32) {
    %c0_i32 = arith.constant 0 : i32
    %c0_i32_0 = arith.constant 0 : i32
    %c0_i32_1 = arith.constant 0 : i32
    return %c0_i32, %c0_i32_0 : i32, i32
  }
  func.func @transform_14(%arg0: i32) -> (i32, i32) {
    %c0_i32 = arith.constant 0 : i32
    %c0_i32_0 = arith.constant 0 : i32
    %c0_i32_1 = arith.constant 0 : i32
    return %c0_i32, %c0_i32_0 : i32, i32
  }
  func.func @transform_15(%arg0: i32) -> (i32, i32) {
    %c0_i32 = arith.constant 0 : i32
    %c0_i32_0 = arith.constant 0 : i32
    %c0_i32_1 = arith.constant 0 : i32
    return %c0_i32, %c0_i32_0 : i32, i32
  }
  func.func @transform_16(%arg0: i32) -> (i32, i32) {
    %c0_i32 = arith.constant 0 : i32
    %c0_i32_0 = arith.constant 0 : i32
    %c0_i32_1 = arith.constant 0 : i32
    return %c0_i32, %c0_i32_0 : i32, i32
  }
  func.func @transform_17(%arg0: i32) -> (i32, i32) {
    %c0_i32 = arith.constant 0 : i32
    %c0_i32_0 = arith.constant 0 : i32
    %c0_i32_1 = arith.constant 0 : i32
    return %c0_i32, %c0_i32_0 : i32, i32
  }
  func.func @transform_18(%arg0: i32) -> (i32, i32) {
    %c0_i32 = arith.constant 0 : i32
    %c0_i32_0 = arith.constant 0 : i32
    %c0_i32_1 = arith.constant 0 : i32
    return %c0_i32, %c0_i32_0 : i32, i32
  }
  func.func @transform_19(%arg0: i32) -> (i32, i32) {
    %c0_i32 = arith.constant 0 : i32
    %c0_i32_0 = arith.constant 0 : i32
    return %arg0, %c0_i32 : i32, i32
  }
}

</mosaic_0001>

<bundles_post_ra>
// kernel: tpu_custom_call.1
= control target key start
LH: loop header
LB: loop body
LE: loop exit
PB: predicated region body
PF: predicated region fallthrough
CT: control target
= control target key end

     0   :  { %s2376_s0 = inlined_call_operand.hbm [shape: f32[2,8,32], index: 0, kind: input, shape index: {}]   ;;  %s2377_s1 = inlined_call_operand.vmem [shape: f32[32,128], index: 1, kind: input, shape index: {}]   ;;  %s2378_s2 = inlined_call_operand.vmem [shape: f32[32,128], index: 2, kind: input, shape index: {}]   ;;  %s2379_s3 = inlined_call_operand.hbm [shape: f32[16,128], index: 3, kind: input, shape index: {}]   ;;  %s2380_s4 = inlined_call_operand.vmem [shape: f32[32,32], index: 4, kind: input, shape index: {}]   ;;  %s2381_s5 = inlined_call_operand.vmem [shape: f32[8,16], index: 5, kind: input, shape index: {}]   ;;  %s2382_s6 = inlined_call_operand.vmem [shape: f32[8,8], index: 6, kind: input, shape index: {}]   ;;  %s2383_s7 = inlined_call_operand.vmem [shape: f32[8,32], index: 7, kind: input, shape index: {}]   ;;  %s2384_s8 = inlined_call_operand.vmem [shape: f32[32,96], index: 8, kind: input, shape index: {}]   ;;  %s2385_s9 = inlined_call_operand.vmem [shape: f32[32,32], index: 9, kind: input, shape index: {}]   ;;  %s2386_s10 = inlined_call_operand.hbm [shape: f32[1,32], index: 10, kind: input, shape index: {}]   ;;  %s2387_s11 = inlined_call_operand.hbm [shape: f32[1,32], index: 11, kind: input, shape index: {}]   ;;  %s2388_s12 = inlined_call_operand.hbm [shape: f32[1,32], index: 12, kind: input, shape index: {}]   ;;  %s2389_s13 = inlined_call_operand.hbm [shape: f32[32,128], index: 13, kind: input, shape index: {}]   ;;  %s2390_s14 = inlined_call_operand.hbm [shape: f32[1,128], index: 14, kind: input, shape index: {}]   ;;  %s2391_s15 = inlined_call_operand.vmem [shape: f32[128,32], index: 15, kind: input, shape index: {}]   ;;  %s2392_s16 = inlined_call_operand.vmem [shape: f32[1,32], index: 16, kind: input, shape index: {}]   ;;  %s2393_s17 = inlined_call_operand.vmem [shape: f32[1,32], index: 17, kind: input, shape index: {}]   ;;  %s2394_s18 = inlined_call_operand.vmem [shape: f32[1,32], index: 18, kind: input, shape index: {}]   ;;  %s2395_s19 = inlined_call_operand.hbm [shape: f32[2,256], index: 19, kind: output, shape index: {}]  }
   0x1   :  { %2402 = sst [smem:[#allocation21_spill]] %s2376_s0 }
   0x2   :  { %2403 = sst [smem:[#allocation22_spill]] %s2377_s1 }
   0x3   :  { %2404 = sst [smem:[#allocation23_spill]] %s2378_s2 }
   0x4   :  { %2405 = sst [smem:[#allocation24_spill]] %s2379_s3 }
   0x5   :  { %24 = vsyncpa [#allocation4], 0 }
   0x6   :  { %25 = vsyncpa [#allocation7], 0 }
   0x7   :  { %26 = vsyncpa [#allocation10], 0 }
   0x8   :  { %27 = vsyncpa [#allocation13], 0 }
   0x9   :  { %28 = vsyncpa [#allocation5], 0  ;;  %s1929_s0 = smov [#allocation6]   ;;  %s1930_s20 = smov [#allocation9]  }
   0xa   :  { %s50_s30 = sshll.u32 %s1929_s0, 4  ;;  %s85_s21 = sshll.u32 %s1930_s20, 4  ;;  %s51_s30 = int_to_ptr.vmem [resolvable:$true] %s50_s30  ;;  %s2044_s21 = int_to_ptr.vmem [resolvable:$true] %s85_s21 }
   0xb   :  { %s2406_s2 = sld [smem:[#allocation24_spill]] }
  0x11   :  { %s1743_s23 = scalar_lea.hbm %s2406_s2, 256 }
  0x12   :  { %p1744_p0 = scmp.ne.s32.totalorder %s2406_s2, %s1743_s23  ;;  %p1747_p1 = scmp.lt.u32.totalorder %s1743_s23, %s2406_s2 }
  0x14   :  { %p1749_p2 = pnand %p1747_p1, %p1744_p0 }
  0x16   :  { %1752 = shalt.err (!%p1749_p2)
}
  0x17   :  { %s1753_s27 = scalar_lea.vmem %s51_s30, 256  ;;  %p1758_p4 = scmp.lt.s32.totalorder %s51_s30, %s51_s30 }
  0x18   :  { %p1754_p3 = scmp.ne.s32.totalorder %s51_s30, %s1753_s27  ;;  %p1759_p5 = scmp.lt.s32.totalorder %s1753_s27, %s1753_s27 }
  0x1a   :  { %p1760_p6 = por %p1759_p5, %p1758_p4 }
  0x1c   :  { %p1761_p7 = pnand %p1760_p6, %p1754_p3 }
  0x1e   :  { %1764 = shalt.err (!%p1761_p7)
}
  0x1f   :  { %s2400_s28 = smov 128   ;;  %s1932_s29 = smov 8  }
  0x20   :  { %56 = dma.hbm_to_vmem [thread:$0]  %s2406_s2, 256, %s51_s30, [#allocation7], %s2400_s28, %s2400_s28, %s1932_s29  }
  0x21   :  { %s1765_s23 = scalar_lea.hbm %s2387_s11, 16 }
  0x22   :  { %p1766_p8 = scmp.ne.s32.totalorder %s2387_s11, %s1765_s23  ;;  %p1769_p9 = scmp.lt.u32.totalorder %s1765_s23, %s2387_s11 }
  0x24   :  { %p1771_p10 = pnand %p1769_p9, %p1766_p8 }
  0x26   :  { %1774 = shalt.err (!%p1771_p10)
}
  0x27   :  { %s1775_s27 = scalar_lea.vmem %s2044_s21, 16  ;;  %s1779_s30 = scalar_lea.vmem %s2044_s21, 32 }
  0x28   :  { %p1776_p11 = scmp.ne.s32.totalorder %s2044_s21, %s1775_s27  ;;  %p1780_p12 = scmp.lt.s32.totalorder %s2044_s21, %s2044_s21 }
  0x29   :  { %p1781_p13 = scmp.lt.s32.totalorder %s1779_s30, %s1775_s27 }
  0x2b   :  { %p1782_p0 = por %p1781_p13, %p1780_p12 }
  0x2d   :  { %p1783_p1 = pnand %p1782_p0, %p1776_p11 }
  0x2f   :  { %1786 = shalt.err (!%p1783_p1)
}
  0x30   :  { %88 = dma.hbm_to_vmem [thread:$0]  %s2387_s11, 16, %s2044_s21, [#allocation10]  }
  0x31   :  { %s1933_s20 = smov [#allocation12]   ;;  %s1934_s22 = smov [#allocation3]  }
  0x32   :  { %s104_s1 = sshll.u32 %s1933_s20, 4  ;;  %s34_s23 = sshll.u32 %s1934_s22, 4  ;;  %s105_s1 = int_to_ptr.vmem [resolvable:$true] %s104_s1  ;;  %s2079_s23 = int_to_ptr.vmem [resolvable:$true] %s34_s23 }
  0x33   :  { %s1787_s3 = scalar_lea.hbm %s2389_s13, 512 }
  0x34   :  { %p1788_p2 = scmp.ne.s32.totalorder %s2389_s13, %s1787_s3  ;;  %p1791_p3 = scmp.lt.u32.totalorder %s1787_s3, %s2389_s13 }
  0x36   :  { %p1793_p4 = pnand %p1791_p3, %p1788_p2 }
  0x38   :  { %1796 = shalt.err (!%p1793_p4)
}
  0x39   :  { %s1797_s11 = scalar_lea.vmem %s105_s1, 512  ;;  %p1802_p6 = scmp.lt.s32.totalorder %s105_s1, %s105_s1 }
  0x3a   :  { %p1798_p5 = scmp.ne.s32.totalorder %s105_s1, %s1797_s11  ;;  %p1803_p7 = scmp.lt.s32.totalorder %s1797_s11, %s1797_s11 }
  0x3c   :  { %p1804_p8 = por %p1803_p7, %p1802_p6 }
  0x3e   :  { %p1805_p9 = pnand %p1804_p8, %p1798_p5 }
  0x40   :  { %1808 = shalt.err (!%p1805_p9)
}
  0x41   :  { %s2407_s21 = smov 128   ;;  %s2408_s28 = sld [smem:[#allocation21_spill]] }
  0x42   :  { %110 = dma.hbm_to_vmem [thread:$0]  %s2389_s13, 512, %s105_s1, [#allocation13], %s2407_s21, %s2407_s21, %s1932_s29  }
  0x47   :  { %s1809_s24 = scalar_lea.hbm %s2408_s28, 256 }
  0x48   :  { %p1810_p10 = scmp.ne.s32.totalorder %s2408_s28, %s1809_s24  ;;  %p1813_p11 = scmp.lt.u32.totalorder %s1809_s24, %s2408_s28 }
  0x4a   :  { %p1815_p12 = pnand %p1813_p11, %p1810_p10 }
  0x4c   :  { %1818 = shalt.err (!%p1815_p12)
}
  0x4d   :  { %s1819_s30 = scalar_lea.vmem %s2079_s23, 256  ;;  %p1824_p0 = scmp.lt.s32.totalorder %s2079_s23, %s2079_s23 }
  0x4e   :  { %p1820_p13 = scmp.ne.s32.totalorder %s2079_s23, %s1819_s30  ;;  %p1825_p1 = scmp.lt.s32.totalorder %s1819_s30, %s1819_s30 }
  0x50   :  { %p1826_p2 = por %p1825_p1, %p1824_p0 }
  0x52   :  { %p1827_p3 = pnand %p1826_p2, %p1820_p13 }
  0x54   :  { %1830 = shalt.err (!%p1827_p3)
}
  0x55   :  { %40 = dma.hbm_to_vmem [thread:$0]  %s2408_s28, 256, %s2079_s23, [#allocation4], %s2407_s21, %s2407_s21, %s1932_s29  }
  0x56   :  { %s1935_s11 = smov [#allocation8]   ;;  %s1936_s0 = smov [#allocation11]  }
  0x57   :  { %s75_s2 = sshll.u32 %s1935_s11, 4  ;;  %s95_s20 = sshll.u32 %s1936_s0, 4  ;;  %s76_s2 = int_to_ptr.vmem [resolvable:$true] %s75_s2  ;;  %s96_s20 = int_to_ptr.vmem [resolvable:$true] %s95_s20 }
  0x58   :  { %s1831_s25 = scalar_lea.hbm %s2386_s10, 16 }
  0x59   :  { %p1832_p4 = scmp.ne.s32.totalorder %s2386_s10, %s1831_s25  ;;  %p1835_p5 = scmp.lt.u32.totalorder %s1831_s25, %s2386_s10 }
  0x5b   :  { %p1837_p6 = pnand %p1835_p5, %p1832_p4 }
  0x5d   :  { %1840 = shalt.err (!%p1837_p6)
}
  0x5e   :  { %s1841_s29 = scalar_lea.vmem %s76_s2, 16  ;;  %s1845_s23 = scalar_lea.vmem %s76_s2, 32 }
  0x5f   :  { %p1842_p7 = scmp.ne.s32.totalorder %s76_s2, %s1841_s29  ;;  %p1846_p8 = scmp.lt.s32.totalorder %s76_s2, %s76_s2 }
  0x60   :  { %p1847_p9 = scmp.lt.s32.totalorder %s1845_s23, %s1841_s29 }
  0x62   :  { %p1848_p10 = por %p1847_p9, %p1846_p8 }
  0x64   :  { %p1849_p11 = pnand %p1848_p10, %p1842_p7 }
  0x66   :  { %1852 = shalt.err (!%p1849_p11)
}
  0x67   :  { %78 = dma.hbm_to_vmem [thread:$0]  %s2386_s10, 16, %s76_s2, [#allocation7]  }
  0x68   :  { %s1853_s11 = scalar_lea.hbm %s2388_s12, 16 }
  0x69   :  { %p1854_p12 = scmp.ne.s32.totalorder %s2388_s12, %s1853_s11  ;;  %p1857_p13 = scmp.lt.u32.totalorder %s1853_s11, %s2388_s12 }
  0x6b   :  { %p1859_p0 = pnand %p1857_p13, %p1854_p12 }
  0x6d   :  { %1862 = shalt.err (!%p1859_p0)
}
  0x6e   :  { %s1863_s3 = scalar_lea.vmem %s96_s20, 16  ;;  %s1867_s26 = scalar_lea.vmem %s96_s20, 32 }
  0x6f   :  { %p1864_p1 = scmp.ne.s32.totalorder %s96_s20, %s1863_s3  ;;  %p1868_p2 = scmp.lt.s32.totalorder %s96_s20, %s96_s20 }
  0x70   :  { %p1869_p3 = scmp.lt.s32.totalorder %s1867_s26, %s1863_s3 }
  0x72   :  { %p1870_p4 = por %p1869_p3, %p1868_p2 }
  0x74   :  { %p1871_p5 = pnand %p1870_p4, %p1864_p1 }
  0x76   :  { %1874 = shalt.err (!%p1871_p5)
}
  0x77   :  { %98 = dma.hbm_to_vmem [thread:$0]  %s2388_s12, 16, %s96_s20, [#allocation10]  }
  0x78   :  { %s1937_s27 = smov [#allocation14]   ;;  %s1875_s21 = scalar_lea.hbm %s2390_s14, 16 }
  0x79   :  { %s117_s30 = sshll.u32 %s1937_s27, 4  ;;  %p1876_p6 = scmp.ne.s32.totalorder %s2390_s14, %s1875_s21  ;;  %s118_s30 = int_to_ptr.vmem [resolvable:$true] %s117_s30 }
  0x7a   :  { %p1879_p7 = scmp.lt.u32.totalorder %s1875_s21, %s2390_s14 }
  0x7c   :  { %p1881_p8 = pnand %p1879_p7, %p1876_p6 }
  0x7e   :  { %1884 = shalt.err (!%p1881_p8)
}
  0x7f   :  { %s1885_s0 = scalar_lea.vmem %s118_s30, 16  ;;  %s1889_s12 = scalar_lea.vmem %s118_s30, 32 }
  0x80   :  { %p1886_p9 = scmp.ne.s32.totalorder %s118_s30, %s1885_s0  ;;  %p1890_p10 = scmp.lt.s32.totalorder %s118_s30, %s118_s30 }
  0x81   :  { %p1891_p11 = scmp.lt.s32.totalorder %s1889_s12, %s1885_s0 }
  0x83   :  { %p1892_p12 = por %p1891_p11, %p1890_p10 }
  0x85   :  { %p1893_p13 = pnand %p1892_p12, %p1886_p9 }
  0x87   :  { %1896 = shalt.err (!%p1893_p13)
}
  0x88   :  { %120 = dma.hbm_to_vmem [thread:$0]  %s2390_s14, 16, %s118_s30, [#allocation13]  }
  0x89   :  { %1919 = dma.done.wait [#allocation4], 256  }
  0x8a   :  { %1920 = vsyncadd [#allocation4], 4294967040 }
  0x8b   :  { %1921 = dma.done.wait [#allocation7], 272  }
  0x8c   :  { %1922 = vsyncadd [#allocation7], 4294967024 }
  0x8d   :  { %1923 = dma.done.wait [#allocation10], 32  }
  0x8e   :  { %1924 = vsyncadd [#allocation10], 4294967264 }
  0x8f   :  { %1925 = dma.done.wait [#allocation13], 528  }
  0x90   :  { %1926 = vsyncadd [#allocation13], 4294966768  ;;  %vm156_vm0 = vcmask 261120   ;;  %v152_v0 = vld [vmem:[%s2384_s8] sm:$0xff]  ;;  %v153_v1 = vld [vmem:[%s2384_s8 + $0x8] sm:$0xff]  ;;  %s2409_s23 = sld [smem:[#allocation22_spill]] }
  0x91   :  { %v154_v2 = vld [vmem:[%s2384_s8 + $0x10] sm:$0xff]  ;;  %v1628_v3 = vpack.c.bf16 %v153_v1, %v152_v0  ;;  %v155_v4 = vld [vmem:[%s2384_s8 + $0x18] sm:$0xff]  ;;  %s2410_s20 = sld [smem:[#allocation23_spill]]  ;;  %v248_v16 = vld [vmem:[%s2380_s4] sm:$0xff]  ;;  %s1938_s13 = smov 64   ;;  %v1940_v45 = vmov 0.0  }
  0x92   :  { %v2164_v5 = vld [vmem:[#allocation3] sm:$0xff]  ;;  %v1632_v6 = vpack.c.bf16 %v155_v4, %v154_v2  ;;  %v2180_v12 = vld [vmem:[#allocation3 + $0x8] sm:$0xff]  ;;  %v249_v18 = vld [vmem:[%s2380_s4 + $0x8] sm:$0xff]  ;;  %s1939_s8 = smov 96   ;;  %vm1941_vm1 = vmmov 0   ;;  %vm581_vm2 = vcmask 130048  }
  0x93   :  { %1508 = vmatprep.mubr.msk.f32.mxu1 %vm156_vm0, %v2164_v5  ;;  %1629 = vmatprep.subr.bf16.mxu1 %v1628_v3  ;;  %v1656_v19 = vpack.c.bf16 %v249_v18, %v248_v16  ;;  %v250_v20 = vld [vmem:[%s2380_s4 + $0x10] sm:$0xff]  ;;  %v251_v21 = vld [vmem:[%s2380_s4 + $0x18] sm:$0xff]  ;;  %v246_v28 = vld [vmem:[#allocation6] sm:$0xff]  ;;  %vm679_vm3 = vcmask 64512   ;;  %vm1329_vm4 = vcmask 523264   ;;  %vm1331_vm5 = vcmask 785408  }
  0x94   :  { %1631 = vmatpush3.bf16.msra.mxu1 %v1628_v3  ;;  %v1660_v22 = vpack.c.bf16 %v251_v21, %v250_v20  ;;  %v247_v29 = vld [vmem:[#allocation6 + $0x8] sm:$0xff]  ;;  %v2221_v37 = vld [vmem:[%s2383_s7] sm:$0xff]  ;;  %s1942_s7 = smov 32   ;;  %vm1375_vm6 = vcmask 1040384  }
  0x95   :  { %1633 = vmatprep.subr.bf16.mxu1 %v1632_v6  ;;  %1657 = vmatprep.subr.bf16.mxu0 %v1656_v19  ;;  %v1652_v30 = vpack.c.bf16 %v247_v29, %v246_v28  ;;  %v253_v28 = vld [vmem:[%s2382_s6] sm:$0xff] }
  0x96   :  { %v238_v7 = vld [vmem:[%s2409_s23] sm:$0xff]  ;;  %v239_v8 = vld [vmem:[%s2409_s23 + $0x8] sm:$0xff]  ;;  %v240_v10 = vld [vmem:[%s2409_s23 + $0x10] sm:$0xff]  ;;  %1659 = vmatpush3.bf16.msra.mxu0 %v1656_v19 }
  0x97   :  { %v1636_v9 = vpack.c.bf16 %v239_v8, %v238_v7  ;;  %v241_v11 = vld [vmem:[%s2409_s23 + $0x18] sm:$0xff]  ;;  %v242_v14 = vld [vmem:[%s2410_s20] sm:$0xff]  ;;  %v243_v15 = vld [vmem:[%s2410_s20 + $0x8] sm:$0xff]  ;;  %1661 = vmatprep.subr.bf16.mxu0 %v1660_v22 }
  0x98   :  { %1635 = vmatpush3.bf16.msra.mxu1 %v1632_v6  ;;  %v1640_v13 = vpack.c.bf16 %v241_v11, %v240_v10  ;;  %v1644_v17 = vpack.c.bf16 %v243_v15, %v242_v14  ;;  %v244_v24 = vld [vmem:[%s2410_s20 + $0x10] sm:$0xff]  ;;  %v245_v25 = vld [vmem:[%s2410_s20 + $0x18] sm:$0xff] }
  0x99   :  { %1637 = vmatprep.subr.bf16.mxu1 %v1636_v9  ;;  %v1648_v27 = vpack.c.bf16 %v245_v25, %v244_v24 }
  0x9a   :  { %1663 = vmatpush3.bf16.msra.mxu0 %v1660_v22 }
  0x9b   :  { %1509 = vmatmul.mubr.msk.f32.vlgmr.msra.gmra.mrb[0].mxu1 %vm156_vm0, %v2180_v12  ;;  %1561 = vmatprep.subr.mxu0 %v1940_v45 }
  0x9c   :  { %1639 = vmatpush3.bf16.msra.mxu1 %v1636_v9 }
  0x9d   :  { %1641 = vmatprep.subr.bf16.mxu1 %v1640_v13 }
  0xa0   :  { %1643 = vmatpush3.bf16.msra.mxu1 %v1640_v13 }
  0xa1   :  { %1645 = vmatprep.subr.bf16.mxu1 %v1644_v17 }
 0x16e   :  { %v1510_v23 = vpop.f32.mrb[0].mxu1 }
 0x16f   :  { %v229_v26 = vpop.f32.mrb[1].mxu1 }
 0x170   :  { %498 = vrot.lane.b32.xlu1 %v229_v26, %s1938_s13  ;;  %336 = vrot.lane.b32.xlu0 %v229_v26, %s1939_s8 }
 0x171   :  { %1519 = vmatprep.mubr.msk.f32.mxu1 %vm156_vm0, %v229_v26  ;;  %v252_v26 = vld [vmem:[%s2381_s5] sm:$0xff] }
 0x172   :  { %1520 = vmatmul.mubr.msk.f32.vlgmr.msra.gmra.mrb[2].mxu1 %vm156_vm0, %v1510_v23 }
 0x173   :  { %1647 = vmatpush3.bf16.msra.mxu1 %v1644_v17 }
 0x174   :  { %500 = vrot.lane.b32.xlu1 %v1510_v23, %s1938_s13  ;;  %338 = vrot.lane.b32.xlu0 %v1510_v23, %s1939_s8 }
 0x175   :  { %1649 = vmatprep.subr.bf16.mxu1 %v1648_v27 }
 0x177   :  { %1651 = vmatpush3.bf16.msra.mxu1 %v1648_v27 }
 0x178   :  { %1653 = vmatprep.subr.bf16.mxu1 %v1652_v30 }
 0x1e2   :  { %v499_v31 = vpop.permute.xlu1 %498  ;;  %v337_v32 = vpop.permute.xlu0 %336 }
 0x1e3   :  { %1530 = vmatprep.mubr.msk.f32.mxu1 %vm156_vm0, %v337_v32  ;;  %1548 = vmatprep.mubr.msk.f32.mxu0 %vm156_vm0, %v499_v31 }
 0x1e6   :  { %v501_v33 = vpop.permute.xlu1 %500  ;;  %v339_v34 = vpop.permute.xlu0 %338 }
 0x1e7   :  { %1531 = vmatmul.mubr.msk.f32.vlgmr.msra.gmra.mrb[4].mxu1 %vm156_vm0, %v339_v34  ;;  %1549 = vmatmul.mubr.msk.f32.vlgmr.msra.gmra.mrb[0].mxu0 %vm156_vm0, %v501_v33 }
 0x1e8   :  { %1655 = vmatpush3.bf16.xpose.msra.mxu1 %v1652_v30  ;;  %1563 = vmatprep.mubr.msk.f32.mxu0 %vm1941_vm1, %v1940_v45 }
 0x1e9   :  { %1551 = vmatprep.subr.mxu1 %v1940_v45 }
 0x245   :  { %v1521_v35 = vpop.f32.mrb[2].mxu1 }
 0x246   :  { %v327_v36 = vpop.f32.mrb[3].mxu1 }
 0x2ba   :  { %v1532_v38 = vpop.f32.mrb[4].mxu1  ;;  %v1550_v39 = vpop.f32.mrb[0].mxu0 }
 0x2bb   :  { %v420_v40 = vmul.f32 %v1532_v38, %v1521_v35  ;;  %v2224_v41 = vmul.f32 %v1550_v39, %v2221_v37  ;;  %v410_v42 = vpop.f32.mrb[5].mxu1  ;;  %v572_v43 = vpop.f32.mrb[1].mxu0  ;;  %v924_v35 = vld [vmem:[%s2385_s9] sm:$0xff]  ;;  %v926_v38 = vld [vmem:[%s2385_s9 + $0x10] sm:$0xff]  ;;  %v927_v39 = vld [vmem:[%s2385_s9 + $0x18] sm:$0xff] }
 0x2bc   :  { %v419_v44 = vmul.f32 %v410_v42, %v327_v36  ;;  %v678_v27 = vmul.f32 %v572_v43, %v2221_v37  ;;  %v925_v36 = vld [vmem:[%s2385_s9 + $0x8] sm:$0xff] }
 0x2bd   :  { %v1664_v37 = vpack.c.bf16 %v925_v36, %v924_v35  ;;  %v1425_v36 = vld [vmem:[#allocation9] ss:$0 sm:$0xff] }
 0x2be   :  { %1537 = vmatprep.mubr.f32.mxu1 %v419_v44 }
 0x2bf   :  { %1538 = vmatmul.mubr.f32.vlgmr.msra.gmra.mrb[6].mxu1 %v420_v40  ;;  %v1668_v40 = vpack.c.bf16 %v927_v39, %v926_v38  ;;  %v1426_v38 = vld [vmem:[#allocation11] ss:$0 sm:$0xff] }
 0x2c0   :  { %1553 = vmatprep.mubr.msk.f32.mxu1 %vm1941_vm1, %v1940_v45 }
 0x392   :  { %v1539_v46 = vpop.f32.mrb[6].mxu1 }
 0x393   :  { %v497_v47 = vmul.f32 0.35355338, %v1539_v46  ;;  %v487_v48 = vpop.f32.mrb[7].mxu1 }
 0x394   :  { %v496_v49 = vmul.f32 0.35355338, %v487_v48 }
 0x395   :  { %v754_v50 = vsel %vm581_vm2, %v497_v47, -inf }
 0x396   :  { %v755_v51 = vrot.slane %v754_v50, 4  ;;  %v582_v52 = vsel %vm581_vm2, %v496_v49, -inf }
 0x397   :  { %v583_v53 = vrot.slane %v582_v52, 4 }
 0x398   :  { %v756_v54 = vmax.f32 %v754_v50, %v755_v51 }
 0x399   :  { %v584_v55 = vmax.f32 %v582_v52, %v583_v53 }
 0x39a   :  { %v757_v56 = vrot.slane %v756_v54, 2 }
 0x39b   :  { %v585_v57 = vrot.slane %v584_v55, 2 }
 0x39c   :  { %v758_v58 = vmax.f32 %v756_v54, %v757_v56 }
 0x39d   :  { %v586_v59 = vmax.f32 %v584_v55, %v585_v57 }
 0x39e   :  { %v759_v60 = vrot.slane %v758_v58, 1 }
 0x39f   :  { %v587_v61 = vrot.slane %v586_v59, 1 }
 0x3a0   :  { %v760_v62 = vmax.f32 %v758_v58, %v759_v60 }
 0x3a1   :  { %v588_v63 = vmax.f32 %v586_v59, %v587_v61 }
 0x3a2   :  { %v761_v0 = vsub.f32 %v497_v47, %v760_v62  ;;  %v1422_v47 = vld [vmem:[#allocation8] ss:$0 sm:$0xff] }
 0x3a3   :  { %v589_v1 = vsub.f32 %v496_v49, %v588_v63 }
 0x3a4   :  { %v762_v2 = vmul.f32 1.442695, %v761_v0  ;;  %v1063_v0 = vld [vmem:[#allocation12] sm:$0xff] }
 0x3a5   :  { %v590_v3 = vmul.f32 1.442695, %v589_v1  ;;  %v1064_v1 = vld [vmem:[#allocation12 + $0x8] sm:$0xff] }
 0x3a6   :  { %1727 = vpow2.f32 %v762_v2  ;;  %v1672_v2 = vpack.c.bf16 %v1064_v1, %v1063_v0 }
 0x3a7   :  { %1729 = vpow2.f32 %v590_v3  ;;  %v1065_v3 = vld [vmem:[#allocation12 + $0x10] sm:$0xff] }
 0x3b0   :  { %v1728_v4 = vpop.eup %1727 }
 0x3b1   :  { %v1730_v6 = vpop.eup %1729  ;;  %v764_v7 = vsel %vm581_vm2, %v1728_v4, 0.0 }
 0x3b2   :  { %v765_v8 = vrot.slane %v764_v7, 4  ;;  %v592_v9 = vsel %vm581_vm2, %v1730_v6, 0.0 }
 0x3b3   :  { %v593_v10 = vrot.slane %v592_v9, 4 }
 0x3b4   :  { %v766_v11 = vadd.f32 %v765_v8, %v764_v7  ;;  %v1157_v7 = vld [vmem:[%s2391_s15] sm:$0xff]  ;;  %v1158_v8 = vld [vmem:[%s2391_s15 + $0x8] sm:$0xff] }
 0x3b5   :  { %v594_v13 = vadd.f32 %v593_v10, %v592_v9  ;;  %v1159_v9 = vld [vmem:[%s2391_s15 + $0x10] sm:$0xff]  ;;  %v1680_v10 = vpack.c.bf16 %v1158_v8, %v1157_v7 }
 0x3b6   :  { %v767_v14 = vrot.slane %v766_v11, 2 }
 0x3b7   :  { %v595_v15 = vrot.slane %v594_v13, 2 }
 0x3b8   :  { %v768_v16 = vadd.f32 %v767_v14, %v766_v11  ;;  %v1160_v11 = vld [vmem:[%s2391_s15 + $0x18] sm:$0xff]  ;;  %v1161_v14 = vld [vmem:[%s2391_s15 + $0x20] sm:$0xff] }
 0x3b9   :  { %v596_v17 = vadd.f32 %v595_v15, %v594_v13  ;;  %v1684_v13 = vpack.c.bf16 %v1160_v11, %v1159_v9  ;;  %v1162_v15 = vld [vmem:[%s2391_s15 + $0x28] sm:$0xff] }
 0x3ba   :  { %v769_v18 = vrot.slane %v768_v16, 1 }
 0x3bb   :  { %v597_v19 = vrot.slane %v596_v17, 1 }
 0x3bc   :  { %v770_v20 = vadd.f32 %v769_v18, %v768_v16  ;;  %v1688_v16 = vpack.c.bf16 %v1162_v15, %v1161_v14  ;;  %v1164_v18 = vld [vmem:[%s2391_s15 + $0x38] sm:$0xff] }
 0x3bd   :  { %v598_v21 = vadd.f32 %v597_v19, %v596_v17  ;;  %v1163_v17 = vld [vmem:[%s2391_s15 + $0x30] sm:$0xff] }
 0x3be   :  { %1731 = vrcp.f32 %v770_v20  ;;  %v1692_v19 = vpack.c.bf16 %v1164_v18, %v1163_v17  ;;  %v1165_v20 = vld [vmem:[%s2391_s15 + $0x40] sm:$0xff] }
 0x3bf   :  { %1733 = vrcp.f32 %v598_v21  ;;  %v1166_v21 = vld [vmem:[%s2391_s15 + $0x48] sm:$0xff]  ;;  %v1431_v17 = vld [vmem:[%s2393_s17] ss:$0 sm:$0xff]  ;;  %s1943_s17 = smov [#allocation15]  }
 0x3c8   :  { %v1732_v22 = vpop.eup %1731 }
 0x3c9   :  { %v1734_v23 = vpop.eup %1733  ;;  %v772_v24 = vmul.f32 %v1732_v22, %v1728_v4  ;;  %v1066_v4 = vld [vmem:[#allocation12 + $0x18] sm:$0xff]  ;;  %v1696_v22 = vpack.c.bf16 %v1166_v21, %v1165_v20  ;;  %v1432_v20 = vld [vmem:[%s2394_s18] ss:$0 sm:$0xff]  ;;  %s1396_s18 = sshll.u32 %s1943_s17, 4  ;;  %s1397_s18 = int_to_ptr.vmem [resolvable:$true] %s1396_s18 }
 0x3ca   :  { %v600_v25 = vmul.f32 %v1734_v23, %v1730_v6  ;;  %v1676_v6 = vpack.c.bf16 %v1066_v4, %v1065_v3  ;;  %v1167_v23 = vld [vmem:[%s2391_s15 + $0x50] sm:$0xff]  ;;  %p1902_p1 = scmp.lt.s32.totalorder %s1397_s18, %s1397_s18 }
 0x3cb   :  { %1562 = vmatpush3.xpose.msk.msra.mxu0 %vm581_vm2, %v772_v24  ;;  %v1168_v24 = vld [vmem:[%s2391_s15 + $0x58] sm:$0xff] }
 0x3cc   :  { %1552 = vmatpush3.xpose.msk.msra.mxu1 %vm581_vm2, %v600_v25  ;;  %1665 = vmatprep.subr.bf16.mxu0 %v1664_v37  ;;  %v1700_v25 = vpack.c.bf16 %v1168_v24, %v1167_v23 }
 0x3cd   :  { %1556 = vmatprep.subr.mxu1 %v1940_v45 }
 0x3ce   :  { %1564 = vmatmul.mubr.msk.f32.vlgmr.msra.gmra.mrb[2].mxu0 %vm581_vm2, %v252_v26 }
 0x3cf   :  { %1554 = vmatmul.mubr.msk.f32.vlgmr.msra.gmra.mrb[8].mxu1 %vm581_vm2, %v252_v26  ;;  %1667 = vmatpush3.bf16.msra.mxu0 %v1664_v37  ;;  %v1169_v26 = vld [vmem:[%s2391_s15 + $0x60] sm:$0xff] }
 0x3d0   :  { %1557 = vmatpush3.msra.mxu1 %v678_v27  ;;  %1558 = vmatprep.mubr.msk.f32.mxu1 %vm1941_vm1, %v1940_v45  ;;  %v1170_v27 = vld [vmem:[%s2391_s15 + $0x68] sm:$0xff] }
 0x3d1   :  { %1566 = vmatprep.subr.mxu1 %v1940_v45  ;;  %1669 = vmatprep.subr.bf16.mxu0 %v1668_v40 }
 0x3d3   :  { %1671 = vmatpush3.bf16.msra.mxu0 %v1668_v40 }
 0x3d4   :  { %1681 = vmatprep.subr.bf16.mxu0 %v1680_v10 }
 0x4a1   :  { %v842_v29 = vpop.f32.mrb[2].mxu0 }
 0x4a2   :  { %v673_v30 = vpop.f32.mrb[8].mxu1  ;;  %v1565_v31 = vpop.f32.mrb[3].mxu0  ;;  %v846_v34 = vmul.f32 %v842_v29, %v253_v28 }
 0x4a3   :  { %v677_v32 = vmul.f32 %v673_v30, %v253_v28  ;;  %v1555_v33 = vpop.f32.mrb[9].mxu1  ;;  %v1704_v28 = vpack.c.bf16 %v1170_v27, %v1169_v26 }
 0x4a5   :  { %1559 = vmatmul.mubr.msk.f32.vlgmr.msra.gmra.mrb[10].mxu1 %vm679_vm3, %v677_v32 }
 0x4a6   :  { %1567 = vmatpush3.msra.mxu1 %v2224_v41  ;;  %1568 = vmatprep.mubr.msk.f32.mxu1 %vm1941_vm1, %v1940_v45 }
 0x4a7   :  { %1673 = vmatprep.subr.bf16.mxu1 %v1672_v2 }
 0x4a9   :  { %1569 = vmatmul.mubr.msk.f32.vlgmr.msra.gmra.mrb[12].mxu1 %vm679_vm3, %v846_v34 }
 0x4aa   :  { %1675 = vmatpush3.bf16.msra.mxu1 %v1672_v2 }
 0x4ab   :  { %1677 = vmatprep.subr.bf16.mxu1 %v1676_v6 }
 0x4ae   :  { %1679 = vmatpush3.bf16.msra.mxu1 %v1676_v6 }
 0x578   :  { %v749_v41 = vpop.f32.mrb[10].mxu1 }
 0x579   :  { %753 = vst.msk [vmem:[#allocation2] sm:$0xff] %vm156_vm0, %v749_v41  ;;  %v1560_v42 = vpop.f32.mrb[11].mxu1 }
 0x57c   :  { %v917_v43 = vpop.f32.mrb[12].mxu1 }
 0x57d   :  { %921 = vst.msk [vmem:[#allocation2 + $0x8] sm:$0xff] %vm156_vm0, %v917_v43  ;;  %v1570_v44 = vpop.f32.mrb[13].mxu1 }
 0x580   :  { %v922_v45 = vld [vmem:[#allocation2] sm:$0xff] }
 0x581   :  { %1579 = vmatprep.mubr.msk.f32.mxu0 %vm156_vm0, %v922_v45  ;;  %v1171_v45 = vld [vmem:[%s2391_s15 + $0x70] sm:$0xff] }
 0x584   :  { %v923_v46 = vld [vmem:[#allocation2 + $0x8] sm:$0xff] }
 0x585   :  { %1580 = vmatmul.mubr.msk.f32.vlgmr.msra.gmra.mrb[4].mxu0 %vm156_vm0, %v923_v46  ;;  %v1172_v46 = vld [vmem:[%s2391_s15 + $0x78] sm:$0xff] }
 0x586   :  { %1683 = vmatpush3.bf16.msra.mxu0 %v1680_v10 }
 0x587   :  { %1685 = vmatprep.subr.bf16.mxu0 %v1684_v13 }
 0x58a   :  { %1687 = vmatpush3.bf16.msra.mxu0 %v1684_v13 }
 0x58b   :  { %1689 = vmatprep.subr.bf16.mxu0 %v1688_v16 }
 0x58e   :  { %1691 = vmatpush3.bf16.msra.mxu0 %v1688_v16 }
 0x58f   :  { %1693 = vmatprep.subr.bf16.mxu0 %v1692_v19 }
 0x592   :  { %1695 = vmatpush3.bf16.msra.mxu0 %v1692_v19 }
 0x593   :  { %1697 = vmatprep.subr.bf16.mxu0 %v1696_v22 }
 0x596   :  { %1699 = vmatpush3.bf16.msra.mxu0 %v1696_v22 }
 0x597   :  { %1701 = vmatprep.subr.bf16.mxu0 %v1700_v25 }
 0x59a   :  { %1703 = vmatpush3.bf16.msra.mxu0 %v1700_v25 }
 0x59b   :  { %1705 = vmatprep.subr.bf16.mxu0 %v1704_v28 }
 0x59e   :  { %1707 = vmatpush3.bf16.msra.mxu0 %v1704_v28 }
 0x658   :  { %v1581_v48 = vpop.f32.mrb[4].mxu0 }
 0x659   :  { %v1013_v49 = vadd.f32 %v1581_v48, %v1422_v47  ;;  %v1007_v50 = vpop.f32.mrb[5].mxu0  ;;  %v1427_v48 = vld [vmem:[#allocation14] ss:$0 sm:$0xff] }
 0x65a   :  { %v1008_v51 = vadd.f32 %v1422_v47, %v1007_v50  ;;  %v1708_v47 = vpack.c.bf16 %v1172_v46, %v1171_v45 }
 0x65b   :  { %v1017_v52 = vadd.f32 %v1013_v49, %v2180_v12 }
 0x65c   :  { %v1016_v53 = vadd.f32 %v1008_v51, %v2164_v5  ;;  %1709 = vmatprep.subr.bf16.mxu0 %v1708_v47 }
 0x65d   :  { %v1023_v54 = vsel %vm156_vm0, %v1017_v52, 0.0  ;;  %1711 = vmatpush3.bf16.msra.mxu0 %v1708_v47 }
 0x65e   :  { %1024 = vadd.xlane.f32.xlu1 %v1023_v54  ;;  %v1020_v55 = vsel %vm156_vm0, %v1016_v53, 0.0 }
 0x65f   :  { %1021 = vadd.xlane.f32.xlu0 %v1020_v55  ;;  %v1430_v55 = vld [vmem:[%s2392_s16] ss:$0 sm:$0xff] }
 0x6eb   :  { %v1025_v56 = vpop.xlane.xlu1 %1024 }
 0x6ec   :  { %v1028_v57 = vmul.f32 0.03125, %v1025_v56  ;;  %v1022_v58 = vpop.xlane.xlu0 %1021 }
 0x6ed   :  { %v1027_v59 = vmul.f32 0.03125, %v1022_v58 }
 0x6ee   :  { %v2274_v60 = vsub.f32 %v1017_v52, %v1028_v57 }
 0x6ef   :  { %v1029_v61 = vsub.f32 %v1016_v53, %v1027_v59 }
 0x6f0   :  { %v1032_v12 = vmul.f32 %v2274_v60, %v2274_v60 }
 0x6f1   :  { %v1031_v62 = vmul.f32 %v1029_v61, %v1029_v61 }
 0x6f2   :  { %v1036_v5 = vsel %vm156_vm0, %v1032_v12, 0.0 }
 0x6f3   :  { %v1033_v63 = vsel %vm156_vm0, %v1031_v62, 0.0 }
 0x6f4   :  { %1034 = vadd.xlane.f32.xlu0 %v1033_v63 }
 0x6f8   :  { %1037 = vadd.xlane.f32.xlu0 %v1036_v5 }
 0x781   :  { %v1035_v29 = vpop.xlane.xlu0 %1034 }
 0x782   :  { %v1039_v30 = vmul.f32 0.03125, %v1035_v29 }
 0x784   :  { %v1041_v31 = vadd.f32 1e-05, %v1039_v30 }
 0x785   :  { %v1038_v32 = vpop.xlane.xlu0 %1037 }
 0x786   :  { %1735 = vrsqrt.f32 %v1041_v31  ;;  %v1040_v33 = vmul.f32 0.03125, %v1038_v32 }
 0x788   :  { %v1042_v34 = vadd.f32 1e-05, %v1040_v33 }
 0x78a   :  { %1737 = vrsqrt.f32 %v1042_v34 }
 0x790   :  { %v1736_v35 = vpop.eup %1735 }
 0x791   :  { %v1045_v37 = vmul.f32 %v1736_v35, %v1029_v61 }
 0x793   :  { %v1053_v39 = vmul.f32 %v1425_v36, %v1045_v37 }
 0x794   :  { %v1738_v40 = vpop.eup %1737 }
 0x795   :  { %v1046_v41 = vmul.f32 %v1738_v40, %v2274_v60  ;;  %v1061_v42 = vadd.f32 %v1426_v38, %v1053_v39 }
 0x797   :  { %v1054_v43 = vmul.f32 %v1425_v36, %v1046_v41  ;;  %1590 = vmatprep.mubr.msk.f32.mxu1 %vm156_vm0, %v1061_v42 }
 0x799   :  { %v1062_v44 = vadd.f32 %v1426_v38, %v1054_v43 }
 0x79b   :  { %1591 = vmatmul.mubr.msk.f32.vlgmr.msra.gmra.mrb[14].mxu1 %vm156_vm0, %v1062_v44 }
 0x86e   :  { %v1592_v49 = vpop.f32.mrb[14].mxu1 }
 0x86f   :  { %v1152_v50 = vadd.f32 %v1592_v49, %v1427_v48  ;;  %v1146_v51 = vpop.f32.mrb[15].mxu1 }
 0x870   :  { %v1147_v52 = vadd.f32 %v1427_v48, %v1146_v51 }
 0x871   :  { %v1156_v54 = vmax.f32 %v1152_v50, 0.0 }
 0x872   :  { %v1155_v53 = vmax.f32 %v1147_v52, 0.0 }
 0x874   :  { %1625 = vmatprep.mubr.f32.mxu0 %v1155_v53 }
 0x875   :  { %1626 = vmatmul.mubr.f32.vlgmr.msra.gmra.mrb[6].mxu0 %v1156_v54 }
 0x948   :  { %v1627_v56 = vpop.f32.mrb[6].mxu0 }
 0x949   :  { %v1252_v57 = vadd.f32 %v1627_v56, %v1430_v55  ;;  %v1246_v58 = vpop.f32.mrb[7].mxu0 }
 0x94a   :  { %v1247_v59 = vadd.f32 %v1430_v55, %v1246_v58 }
 0x94b   :  { %v1256_v60 = vadd.f32 %v1252_v57, %v1062_v44 }
 0x94c   :  { %v1255_v61 = vadd.f32 %v1247_v59, %v1061_v42 }
 0x94d   :  { %v1262_v62 = vsel %vm156_vm0, %v1256_v60, 0.0 }
 0x94e   :  { %1263 = vadd.xlane.f32.xlu1 %v1262_v62  ;;  %v1259_v63 = vsel %vm156_vm0, %v1255_v61, 0.0 }
 0x94f   :  { %1260 = vadd.xlane.f32.xlu0 %v1259_v63 }
 0x9db   :  { %v1264_v12 = vpop.xlane.xlu1 %1263 }
 0x9dc   :  { %v1266_v5 = vmul.f32 0.03125, %v1264_v12  ;;  %v1261_v0 = vpop.xlane.xlu0 %1260 }
 0x9dd   :  { %v1265_v1 = vmul.f32 0.03125, %v1261_v0 }
 0x9de   :  { %v1268_v2 = vsub.f32 %v1256_v60, %v1266_v5 }
 0x9df   :  { %v1267_v3 = vsub.f32 %v1255_v61, %v1265_v1 }
 0x9e0   :  { %v1270_v4 = vmul.f32 %v1268_v2, %v1268_v2 }
 0x9e1   :  { %v1269_v6 = vmul.f32 %v1267_v3, %v1267_v3 }
 0x9e2   :  { %v1274_v7 = vsel %vm156_vm0, %v1270_v4, 0.0 }
 0x9e3   :  { %1275 = vadd.xlane.f32.xlu1 %v1274_v7  ;;  %v1271_v8 = vsel %vm156_vm0, %v1269_v6, 0.0 }
 0x9e4   :  { %1272 = vadd.xlane.f32.xlu0 %v1271_v8 }
 0xa70   :  { %v1276_v9 = vpop.xlane.xlu1 %1275 }
 0xa71   :  { %v1278_v10 = vmul.f32 0.03125, %v1276_v9  ;;  %v1273_v11 = vpop.xlane.xlu0 %1272 }
 0xa72   :  { %v1277_v13 = vmul.f32 0.03125, %v1273_v11 }
 0xa73   :  { %v1280_v14 = vadd.f32 1e-05, %v1278_v10 }
 0xa74   :  { %v1279_v15 = vadd.f32 1e-05, %v1277_v13 }
 0xa75   :  { %1739 = vrsqrt.f32 %v1280_v14 }
 0xa76   :  { %1741 = vrsqrt.f32 %v1279_v15 }
 0xa7f   :  { %v1740_v16 = vpop.eup %1739 }
 0xa80   :  { %v1742_v18 = vpop.eup %1741  ;;  %v1284_v19 = vmul.f32 %v1740_v16, %v1268_v2 }
 0xa81   :  { %v1283_v22 = vmul.f32 %v1742_v18, %v1267_v3 }
 0xa82   :  { %v1292_v21 = vmul.f32 %v1431_v17, %v1284_v19 }
 0xa83   :  { %v1291_v24 = vmul.f32 %v1431_v17, %v1283_v22 }
 0xa84   :  { %v1300_v23 = vadd.f32 %v1432_v20, %v1292_v21 }
 0xa85   :  { %v1299_v27 = vadd.f32 %v1432_v20, %v1291_v24 }
 0xa86   :  { %v1337_v25 = vrot.slane %v1300_v23, 1  ;;  %v1351_v26 = vrot.slane %v1300_v23, 5  ;;  %v1341_v28 = vrot.slane %v1300_v23, 2  ;;  %v1345_v29 = vrot.slane %v1300_v23, 3 }
 0xa87   :  { %v1355_v30 = vrot.slane %v1300_v23, 6  ;;  %v1302_v31 = vrot.slane %v1299_v27, 1  ;;  %v1359_v32 = vrot.slane %v1300_v23, 7  ;;  %v1306_v33 = vrot.slane %v1299_v27, 2 }
 0xa88   :  { %1338 = vrot.lane.b32.xlu1 %v1337_v25, %s1942_s7  ;;  %1352 = vrot.lane.b32.xlu0 %v1351_v26, %s1942_s7  ;;  %v1316_v34 = vrot.slane %v1299_v27, 5  ;;  %v1310_v35 = vrot.slane %v1299_v27, 3  ;;  %v1320_v36 = vrot.slane %v1299_v27, 6  ;;  %v1324_v37 = vrot.slane %v1299_v27, 7 }
 0xa89   :  { %v1349_v48 = vrot.slane %v1300_v23, 4  ;;  %v1314_v57 = vrot.slane %v1299_v27, 4 }
 0xa8c   :  { %1342 = vrot.lane.b32.xlu1 %v1341_v28, %s1938_s13  ;;  %1346 = vrot.lane.b32.xlu0 %v1345_v29, %s1939_s8 }
 0xa90   :  { %1356 = vrot.lane.b32.xlu1 %v1355_v30, %s1938_s13  ;;  %1303 = vrot.lane.b32.xlu0 %v1302_v31, %s1942_s7 }
 0xa94   :  { %1360 = vrot.lane.b32.xlu1 %v1359_v32, %s1939_s8  ;;  %1307 = vrot.lane.b32.xlu0 %v1306_v33, %s1938_s13 }
 0xa98   :  { %1317 = vrot.lane.b32.xlu1 %v1316_v34, %s1942_s7  ;;  %1311 = vrot.lane.b32.xlu0 %v1310_v35, %s1939_s8 }
 0xa9c   :  { %1321 = vrot.lane.b32.xlu1 %v1320_v36, %s1938_s13  ;;  %s1897_s13 = scalar_lea.vmem %s1397_s18, 64 }
 0xa9d   :  { %p1898_p0 = scmp.ne.s32.totalorder %s1397_s18, %s1897_s13  ;;  %p1903_p2 = scmp.lt.s32.totalorder %s1897_s13, %s1897_s13 }
 0xa9f   :  { %p1904_p3 = por %p1903_p2, %p1902_p1 }
 0xaa0   :  { %1325 = vrot.lane.b32.xlu1 %v1324_v37, %s1939_s8 }
 0xaa1   :  { %p1905_p4 = pnand %p1904_p3, %p1898_p0 }
 0xafa   :  { %v1339_v38 = vpop.permute.xlu1 %1338  ;;  %v1353_v39 = vpop.permute.xlu0 %1352 }
 0xafb   :  { %v1363_v47 = vsel %vm156_vm0, %v1300_v23, %v1339_v38  ;;  %v1366_v50 = vsel %vm156_vm0, %v1349_v48, %v1353_v39 }
 0xafe   :  { %v1343_v40 = vpop.permute.xlu1 %1342  ;;  %v1347_v41 = vpop.permute.xlu0 %1346 }
 0xaff   :  { %v1364_v49 = vsel %vm1329_vm4, %v1363_v47, %v1343_v40 }
 0xb00   :  { %v1365_v54 = vsel %vm1331_vm5, %v1364_v49, %v1347_v41 }
 0xb01   :  { %v1371_v61 = vrot.slane %v1365_v54, 7 }
 0xb02   :  { %v1357_v42 = vpop.permute.xlu1 %1356  ;;  %v1304_v43 = vpop.permute.xlu0 %1303 }
 0xb03   :  { %v1367_v51 = vsel %vm1329_vm4, %v1366_v50, %v1357_v42  ;;  %v1328_v55 = vsel %vm156_vm0, %v1299_v27, %v1304_v43 }
 0xb06   :  { %v1361_v44 = vpop.permute.xlu1 %1360  ;;  %v1308_v45 = vpop.permute.xlu0 %1307 }
 0xb07   :  { %v1368_v56 = vsel %vm1331_vm5, %v1367_v51, %v1361_v44  ;;  %v1330_v58 = vsel %vm1329_vm4, %v1328_v55, %v1308_v45 }
 0xb08   :  { %v1372_v62 = vrot.slane %v1368_v56, 7 }
 0xb0a   :  { %v1318_v46 = vpop.permute.xlu1 %1317  ;;  %v1312_v52 = vpop.permute.xlu0 %1311 }
 0xb0b   :  { %v1333_v59 = vsel %vm156_vm0, %v1314_v57, %v1318_v46  ;;  %v1332_v60 = vsel %vm1331_vm5, %v1330_v58, %v1312_v52 }
 0xb0c   :  { %v1376_v0 = vsel %vm1375_vm6, %v1332_v60, %v1371_v61 }
 0xb0e   :  { %v1322_v53 = vpop.permute.xlu1 %1321 }
 0xb0f   :  { %v1334_v63 = vsel %vm1329_vm4, %v1333_v59, %v1322_v53 }
 0xb12   :  { %v1326_v12 = vpop.permute.xlu1 %1325 }
 0xb13   :  { %v1335_v5 = vsel %vm1331_vm5, %v1334_v63, %v1326_v12 }
 0xb14   :  { %v1377_v1 = vsel %vm1375_vm6, %v1335_v5, %v1372_v62 }
 0xb15   :  { %v1380_v2 = vcombine.low %v1376_v0, %v1377_v1 }
 0xb17   :  { %1433 = vst.sshfl [vmem:[#allocation15] sm:$0x33 pattern:$0x76325410] %v1380_v2 }
 0xb18   :  { %1908 = shalt.err (!%p1905_p4)
}
 0xb19   :  { %s1909_s0 = scalar_lea.hbm %s2395_s19, 64 }
 0xb1a   :  { %p1910_p5 = scmp.ne.s32.totalorder %s2395_s19, %s1909_s0  ;;  %p1913_p6 = scmp.lt.u32.totalorder %s1909_s0, %s2395_s19 }
 0xb1c   :  { %p1915_p7 = pnand %p1913_p6, %p1910_p5 }
 0xb1e   :  { %1918 = shalt.err (!%p1915_p7)
}
 0xb1f   :  { %1399 = dma.vmem_to_hbm [thread:$0]  %s1397_s18, 64, %s2395_s19, [#allocation5]  }
 0xb20   :  { %1927 = dma.done.wait [#allocation5], 64  }
 0xb21   :  { %1928 = vsyncadd [#allocation5], 4294967232 }
 0xb22   :  { %1403 = vsyncpa [#allocation4], 1 }
 0xb23   :  { %1404 = vsyncpa [#allocation7], 1 }
 0xb24   :  { %1405 = vsyncpa [#allocation10], 1 }
 0xb25   :  { %1406 = vsyncpa [#allocation13], 1 }
 0xb26   :  { %1407 = vsyncpa [#allocation5], 1 }

</bundles_post_ra>
